<compile_context>
chip_gen: v7x
topology: tpu7x:2x2x1
jax: 0.10.0
libtpu: 0.0.40
codegen_flags: <defaults>
</compile_context>

<pallas_src>
import math

import jax
import jax.numpy as jnp
from jax import lax
from jax.experimental import pallas as pl
from jax.experimental.pallas import tpu as pltpu

# ----------------------------- tiny ViT config ------------------------------
IMG = 32            # image spatial size (instead of 224)
PATCH = 16          # patch size (same as vit_base_patch16)
IN_CH = 3
D = 32              # embed dim (instead of 768)
HEADS = 4           # heads (instead of 12)
DEPTH = 2           # transformer blocks (instead of 12)
MLP = 4 * D         # mlp hidden dim (ratio 4, like ViT-Base)
N_CLASSES = 10
HEAD_DIM = D // HEADS
N_PATCH = (IMG // PATCH) ** 2
SEQ = N_PATCH + 1   # + CLS token
CPP = IN_CH * PATCH * PATCH
LN_EPS = 1e-6       # timm ViT uses eps=1e-6
NPAD = ((N_CLASSES + 127) // 128) * 128   # lane-dense logits width (=128)
SLAB_W = 128                              # lane width of the parameter slab

_SQRT1_2 = 1.0 / math.sqrt(2.0)


# ------------------------- parameter-slab layout -----------------------------
def _align8(n):
    return ((n + 7) // 8) * 8


def _make_layout():
    """Static row layout of the single coalesced parameter slab.

    Each entry: name -> (row_offset, load_rows, load_cols).  Every region
    starts at an 8-row-aligned offset; unused lanes/rows are zero-padded.
    """
    order = [("patch_w", CPP, D), ("seq_bias", SEQ, D)]
    for i in range(DEPTH):
        order += [
            (f"b{i}_ln1_g", 1, D), (f"b{i}_ln1_b", 1, D),
            (f"b{i}_wqkv", D, SLAB_W), (f"b{i}_bqkv", 1, SLAB_W),
            (f"b{i}_proj_w", D, D), (f"b{i}_proj_b", 1, D),
            (f"b{i}_ln2_g", 1, D), (f"b{i}_ln2_b", 1, D),
            (f"b{i}_fc1_w", D, MLP), (f"b{i}_fc1_b", 1, MLP),
            (f"b{i}_fc2_w", MLP, D), (f"b{i}_fc2_b", 1, D),
        ]
    order += [("norm_g", 1, D), ("norm_b", 1, D),
              ("head_w", D, NPAD), ("head_b", 1, NPAD)]
    layout, cur = {}, 0
    for name, rows, cols in order:
        layout[name] = (cur, rows, cols)
        cur += _align8(rows)
    return order, layout, cur


_ORDER, _LAYOUT, SLAB_ROWS = _make_layout()


# --------------------------- in-kernel helpers -------------------------------
def _layernorm(x, g, b):
    mu = jnp.mean(x, axis=-1, keepdims=True)
    xc = x - mu
    var = jnp.mean(xc * xc, axis=-1, keepdims=True)
    return xc * lax.rsqrt(var + LN_EPS) * g + b


def _erf(z):
    # Abramowitz & Stegun 7.1.26, |abs err| < 1.5e-7 (~f32 eps) -> matches
    # nn.GELU()'s exact-erf GELU to f32 precision.  The 1/(1+a|z|) divide is
    # done with the EUP approximate reciprocal + one Newton step (err ~2^-24)
    # so it stays off the VALU critical path.
    az = jnp.abs(z)
    d = 1.0 + 0.3275911 * az
    t = pl.reciprocal(d, approx=True)
    t = t * (2.0 - d * t)                      # Newton refinement
    poly = ((((1.061405429 * t - 1.453152027) * t + 1.421413741) * t
             - 0.284496736) * t + 0.254829592) * t
    y = 1.0 - poly * jnp.exp(-(z * z))
    return jnp.where(z >= 0.0, y, -y)


def _gelu_exact(x):
    return 0.5 * x * (1.0 + _erf(x * _SQRT1_2))


# ------------------------------ fused kernel ---------------------------------
def _make_vit_kernel(bpc):
    """Kernel processing `bpc` samples per grid step; all params in one slab."""
    f32 = jnp.float32

    def kernel(patches_ref, slab_ref, o_ref):
        # patches_ref: (1, bpc, SEQ, CPP)  (row 0 of each sample = zeros = CLS)
        # slab_ref:    (SLAB_ROWS, 128)    coalesced parameters
        # o_ref:       (1, bpc, NPAD)      lane-dense logits

        def P(name):
            r, n, c = _LAYOUT[name]
            return slab_ref[r:r + n, 0:c]

        patch_w = P("patch_w")                 # (CPP, D)
        seq_bias = P("seq_bias")               # (SEQ, D) cls/pos/patch-bias fold
        norm_g, norm_b = P("norm_g"), P("norm_b")
        head_w, head_b = P("head_w"), P("head_b")

        outs = []
        for i in range(bpc):                   # static, small
            # ---- patch embed + (cls_token / pos_embed / patch bias) ----
            x = jnp.dot(patches_ref[0, i], patch_w,
                        preferred_element_type=f32) + seq_bias       # (SEQ, D)

            for bi in range(DEPTH):
                ln1_g, ln1_b = P(f"b{bi}_ln1_g"), P(f"b{bi}_ln1_b")
                wqkv, bqkv = P(f"b{bi}_wqkv"), P(f"b{bi}_bqkv")      # (D,128),(1,128)
                proj_w, proj_b = P(f"b{bi}_proj_w"), P(f"b{bi}_proj_b")
                ln2_g, ln2_b = P(f"b{bi}_ln2_g"), P(f"b{bi}_ln2_b")
                fc1_w, fc1_b = P(f"b{bi}_fc1_w"), P(f"b{bi}_fc1_b")
                fc2_w, fc2_b = P(f"b{bi}_fc2_w"), P(f"b{bi}_fc2_b")

                # ---- attention: one merged QKV matmul (lane-dense 96/128) ----
                h = _layernorm(x, ln1_g, ln1_b)
                qkv = jnp.dot(h, wqkv, preferred_element_type=f32) + bqkv
                # qkv layout: [Q(D) | K(D) | V(D) | 0-pad]; Q pre-scaled by
                # 1/sqrt(head_dim); K bias dropped (softmax-invariant).
                acc = jnp.zeros((SEQ, D), f32)
                for hh in range(HEADS):        # fully unrolled, HEADS=4
                    o0 = hh * HEAD_DIM
                    q = qkv[:, o0:o0 + HEAD_DIM]
                    k = qkv[:, D + o0:D + o0 + HEAD_DIM]
                    v = qkv[:, 2 * D + o0:2 * D + o0 + HEAD_DIM]
                    s = lax.dot_general(q, k, (((1,), (1,)), ((), ())),
                                        preferred_element_type=f32)  # (SEQ,SEQ)
                    s = s - jnp.max(s, axis=-1, keepdims=True)
                    p = jnp.exp(s)
                    p = p * pl.reciprocal(jnp.sum(p, axis=-1, keepdims=True),
                                          approx=True)
                    o = jnp.dot(p, v, preferred_element_type=f32)    # (SEQ,Dh)
                    # fused per-head output projection -> no head concat
                    acc = acc + jnp.dot(o, proj_w[o0:o0 + HEAD_DIM, :],
                                        preferred_element_type=f32)
                x = x + acc + proj_b

                # ---- MLP: x += fc2(gelu(fc1(LN(x)))) ----
                h = _layernorm(x, ln2_g, ln2_b)
                h = jnp.dot(h, fc1_w, preferred_element_type=f32) + fc1_b
                h = _gelu_exact(h)
                h = jnp.dot(h, fc2_w, preferred_element_type=f32) + fc2_b
                x = x + h

            # ---- final LayerNorm on CLS token + classification head ----
            cls = _layernorm(x[0:1, :], norm_g, norm_b)               # (1, D)
            outs.append(jnp.dot(cls, head_w, preferred_element_type=f32)
                        + head_b)                                     # (1, NPAD)

        o_ref[0] = jnp.concatenate(outs, axis=0).astype(o_ref.dtype)  # (bpc,NPAD)

    return kernel


# ------------------------------- parameters ---------------------------------
def init_params(key):
    def nrm(k, shape, scale=0.02):
        return (scale * jax.random.normal(k, shape)).astype(jnp.float32)

    keys = iter(jax.random.split(key, 4 + 4 * DEPTH))
    params = {
        # patch-embed conv (D, C, P, P) expressed as a (C*P*P, D) matmul weight
        "patch_w": nrm(next(keys), (CPP, D)),
        "patch_b": jnp.zeros((1, D), jnp.float32),
        "cls_token": nrm(next(keys), (1, 1, D)),
        "pos_embed": nrm(next(keys), (1, SEQ, D)),
        "norm_g": jnp.ones((1, D), jnp.float32),
        "norm_b": jnp.zeros((1, D), jnp.float32),
        "head_w": nrm(next(keys), (D, N_CLASSES)),
        "head_b": jnp.zeros((1, N_CLASSES), jnp.float32),
        "blocks": [],
    }
    for _ in range(DEPTH):
        params["blocks"].append({
            "ln1_g": jnp.ones((1, D), jnp.float32),
            "ln1_b": jnp.zeros((1, D), jnp.float32),
            "qkv_w": nrm(next(keys), (D, 3 * D)),
            "qkv_b": jnp.zeros((1, 3 * D), jnp.float32),
            "proj_w": nrm(next(keys), (D, D)),
            "proj_b": jnp.zeros((1, D), jnp.float32),
            "ln2_g": jnp.ones((1, D), jnp.float32),
            "ln2_b": jnp.zeros((1, D), jnp.float32),
            "fc1_w": nrm(next(keys), (D, MLP)),
            "fc1_b": jnp.zeros((1, MLP), jnp.float32),
            "fc2_w": nrm(next(keys), (MLP, D)),
            "fc2_b": jnp.zeros((1, D), jnp.float32),
        })
    return params


def _build_slab(params):
    """Coalesce all parameters into one (SLAB_ROWS, 128) f32 slab (layout
    plumbing + free algebra; runs under jit, parameter-only, tiny)."""
    scale = HEAD_DIM ** -0.5

    # cls_token + pos_embed + patch bias folded into one (SEQ, D) additive slab
    pos = params["pos_embed"][0]
    seq_bias = pos + params["patch_b"]
    seq_bias = seq_bias.at[0:1, :].set(pos[0:1, :] + params["cls_token"][0])

    tensors = {
        "patch_w": params["patch_w"], "seq_bias": seq_bias,
        "norm_g": params["norm_g"], "norm_b": params["norm_b"],
        "head_w": params["head_w"], "head_b": params["head_b"],
    }
    for i, blk in enumerate(params["blocks"]):
        qw, qb = blk["qkv_w"], blk["qkv_b"]
        # fold 1/sqrt(head_dim) into Q weight+bias (exact); drop K bias (exact:
        # softmax is invariant to the constant per-row shift q_i . bk).
        wqkv = jnp.concatenate(
            [qw[:, 0:D] * scale, qw[:, D:2 * D], qw[:, 2 * D:3 * D]], axis=1)
        bqkv = jnp.concatenate(
            [qb[:, 0:D] * scale, jnp.zeros_like(qb[:, 0:D]), qb[:, 2 * D:3 * D]],
            axis=1)
        tensors.update({
            f"b{i}_ln1_g": blk["ln1_g"], f"b{i}_ln1_b": blk["ln1_b"],
            f"b{i}_wqkv": wqkv, f"b{i}_bqkv": bqkv,
            f"b{i}_proj_w": blk["proj_w"], f"b{i}_proj_b": blk["proj_b"],
            f"b{i}_ln2_g": blk["ln2_g"], f"b{i}_ln2_b": blk["ln2_b"],
            f"b{i}_fc1_w": blk["fc1_w"], f"b{i}_fc1_b": blk["fc1_b"],
            f"b{i}_fc2_w": blk["fc2_w"], f"b{i}_fc2_b": blk["fc2_b"],
        })

    pieces = []
    for name, rows, _load_cols in _ORDER:
        arr = tensors[name].astype(jnp.float32)
        r, c = arr.shape
        pieces.append(jnp.pad(arr, ((0, _align8(rows) - r), (0, SLAB_W - c))))
    return jnp.concatenate(pieces, axis=0)          # (SLAB_ROWS, 128)


# -------------------------------- forward -----------------------------------
def vit_forward(x, params):
    B = x.shape[0]
    hp = IMG // PATCH

    # At most 2 grid steps: one per v7x TensorCore, batch folded into the
    # block so v5e/v6e don't pay B grid-step overheads.
    G = 2 if B >= 2 else 1
    BPC = -(-B // G)                      # samples per grid step
    BPAD = G * BPC

    # conv k=16, s=16 == per-patch linear: unfold to (B, N_PATCH, C*P*P)
    patches = (x.reshape(B, IN_CH, hp, PATCH, hp, PATCH)
                 .transpose(0, 2, 4, 1, 3, 5)
                 .reshape(B, N_PATCH, CPP))
    # prepend a zero row (CLS slot) and pad batch to G*BPC
    patches = jnp.pad(patches, ((0, BPAD - B), (1, 0), (0, 0)))
    patches = patches.reshape(G, BPC, SEQ, CPP)

    slab = _build_slab(params)

    out = pl.pallas_call(
        _make_vit_kernel(BPC),
        out_shape=jax.ShapeDtypeStruct((G, BPC, NPAD), jnp.float32),
        grid=(G,),
        in_specs=[
            pl.BlockSpec((1, BPC, SEQ, CPP), lambda g: (g, 0, 0, 0)),
            # single coalesced, VMEM-resident parameter slab (constant index)
            pl.BlockSpec((SLAB_ROWS, SLAB_W), lambda g: (0, 0)),
        ],
        out_specs=pl.BlockSpec((1, BPC, NPAD), lambda g: (g, 0, 0)),
        compiler_params=pltpu.CompilerParams(
            dimension_semantics=("parallel",)),
    )(patches, slab)

    return out.reshape(BPAD, NPAD)[:B, :N_CLASSES]    # (B, n_classes)


# ---------------------------------- main -------------------------------------
if __name__ == "__main__":
    key = jax.random.PRNGKey(0)
    k_param, k_x = jax.random.split(key)
    params = init_params(k_param)
    x = jax.random.normal(k_x, (2, IN_CH, IMG, IMG), dtype=jnp.float32)  # NCHW

    logits = jax.jit(vit_forward)(x, params)
    logits = jax.block_until_ready(logits)
    assert logits.shape == (2, N_CLASSES)
    assert bool(jnp.all(jnp.isfinite(logits)))
    print("KERNEL_OK")
</pallas_src>

<mosaic_0001>
module attributes {stable_mosaic.version = 11 : i64} {
  func.func @kernel(%arg0: i32, %arg1: memref<1x1x5x768xf32, #tpu.memory_space<vmem>>, %arg2: memref<1408x128xf32, #tpu.memory_space<vmem>>, %arg3: memref<1x1x128xf32, #tpu.memory_space<vmem>>) attributes {dimension_semantics = [#tpu.dimension_semantics<parallel>], iteration_bounds = array<i64: 2>, scalar_prefetch = 0 : i64, scratch_operands = 0 : i64, tpu.core_type = #tpu.core_type<tc>, window_params = [{transform_indices = @transform_0, window_bounds = array<i64: 1, 1, 5, 768>}, {pipeline_mode = #tpu.pipeline_mode<synchronous>, transform_indices = @transform_1, window_bounds = array<i64: 1408, 128>}, {transform_indices = @transform_2, window_bounds = array<i64: 1, 1, 128>}]} {
    %c0 = arith.constant 0 : index
    %c0_0 = arith.constant 0 : index
    %0 = vector.load %arg2[%c0, %c0_0] : memref<1408x128xf32, #tpu.memory_space<vmem>>, vector<768x32xf32>
    %c768 = arith.constant 768 : index
    %c0_1 = arith.constant 0 : index
    %1 = vector.load %arg2[%c768, %c0_1] : memref<1408x128xf32, #tpu.memory_space<vmem>>, vector<5x32xf32>
    %c1352 = arith.constant 1352 : index
    %c0_2 = arith.constant 0 : index
    %2 = vector.load %arg2[%c1352, %c0_2] : memref<1408x128xf32, #tpu.memory_space<vmem>>, vector<1x32xf32>
    %c1360 = arith.constant 1360 : index
    %c0_3 = arith.constant 0 : index
    %3 = vector.load %arg2[%c1360, %c0_3] : memref<1408x128xf32, #tpu.memory_space<vmem>>, vector<1x32xf32>
    %c1368 = arith.constant 1368 : index
    %c0_4 = arith.constant 0 : index
    %4 = vector.load %arg2[%c1368, %c0_4] : memref<1408x128xf32, #tpu.memory_space<vmem>>, vector<32x128xf32>
    %c1400 = arith.constant 1400 : index
    %c0_5 = arith.constant 0 : index
    %5 = vector.load %arg2[%c1400, %c0_5] : memref<1408x128xf32, #tpu.memory_space<vmem>>, vector<1x128xf32>
    %c0_6 = arith.constant 0 : index
    %c0_7 = arith.constant 0 : index
    %c0_8 = arith.constant 0 : index
    %c0_9 = arith.constant 0 : index
    %6 = vector.load %arg1[%c0_6, %c0_7, %c0_8, %c0_9] : memref<1x1x5x768xf32, #tpu.memory_space<vmem>>, vector<1x1x5x768xf32>
    %7 = vector.shape_cast %6 : vector<1x1x5x768xf32> to vector<5x768xf32>
    %cst = arith.constant dense<0.000000e+00> : vector<5x32xf32>
    %8 = tpu.matmul %7, %0, %cst {dimension_numbers = #tpu.dot_dimension_numbers<[1], [0], [0], [1], [0, 0, 1, 1], [], []>} : vector<5x768xf32>, vector<768x32xf32>, vector<5x32xf32> -> vector<5x32xf32>
    %9 = arith.addf %8, %1 : vector<5x32xf32>
    %c776 = arith.constant 776 : index
    %c0_10 = arith.constant 0 : index
    %10 = vector.load %arg2[%c776, %c0_10] : memref<1408x128xf32, #tpu.memory_space<vmem>>, vector<1x32xf32>
    %c784 = arith.constant 784 : index
    %c0_11 = arith.constant 0 : index
    %11 = vector.load %arg2[%c784, %c0_11] : memref<1408x128xf32, #tpu.memory_space<vmem>>, vector<1x32xf32>
    %c792 = arith.constant 792 : index
    %c0_12 = arith.constant 0 : index
    %12 = vector.load %arg2[%c792, %c0_12] : memref<1408x128xf32, #tpu.memory_space<vmem>>, vector<32x128xf32>
    %c824 = arith.constant 824 : index
    %c0_13 = arith.constant 0 : index
    %13 = vector.load %arg2[%c824, %c0_13] : memref<1408x128xf32, #tpu.memory_space<vmem>>, vector<1x128xf32>
    %c832 = arith.constant 832 : index
    %c0_14 = arith.constant 0 : index
    %14 = vector.load %arg2[%c832, %c0_14] : memref<1408x128xf32, #tpu.memory_space<vmem>>, vector<32x32xf32>
    %c864 = arith.constant 864 : index
    %c0_15 = arith.constant 0 : index
    %15 = vector.load %arg2[%c864, %c0_15] : memref<1408x128xf32, #tpu.memory_space<vmem>>, vector<1x32xf32>
    %c872 = arith.constant 872 : index
    %c0_16 = arith.constant 0 : index
    %16 = vector.load %arg2[%c872, %c0_16] : memref<1408x128xf32, #tpu.memory_space<vmem>>, vector<1x32xf32>
    %c880 = arith.constant 880 : index
    %c0_17 = arith.constant 0 : index
    %17 = vector.load %arg2[%c880, %c0_17] : memref<1408x128xf32, #tpu.memory_space<vmem>>, vector<1x32xf32>
    %c888 = arith.constant 888 : index
    %c0_18 = arith.constant 0 : index
    %18 = vector.load %arg2[%c888, %c0_18] : memref<1408x128xf32, #tpu.memory_space<vmem>>, vector<32x128xf32>
    %c920 = arith.constant 920 : index
    %c0_19 = arith.constant 0 : index
    %19 = vector.load %arg2[%c920, %c0_19] : memref<1408x128xf32, #tpu.memory_space<vmem>>, vector<1x128xf32>
    %c928 = arith.constant 928 : index
    %c0_20 = arith.constant 0 : index
    %20 = vector.load %arg2[%c928, %c0_20] : memref<1408x128xf32, #tpu.memory_space<vmem>>, vector<128x32xf32>
    %c1056 = arith.constant 1056 : index
    %c0_21 = arith.constant 0 : index
    %21 = vector.load %arg2[%c1056, %c0_21] : memref<1408x128xf32, #tpu.memory_space<vmem>>, vector<1x32xf32>
    %cst_22 = arith.constant dense<0.000000e+00> : vector<5xf32>
    %22 = vector.multi_reduction <add>, %9, %cst_22 [1] : vector<5x32xf32> to vector<5xf32>
    %23 = vector.shape_cast %22 : vector<5xf32> to vector<5x1xf32>
    %cst_23 = arith.constant 3.200000e+01 : f32
    %24 = vector.broadcast %cst_23 : f32 to vector<5x1xf32>
    %25 = arith.divf %23, %24 : vector<5x1xf32>
    %26 = vector.broadcast %25 : vector<5x1xf32> to vector<5x32xf32>
    %27 = arith.subf %9, %26 : vector<5x32xf32>
    %28 = arith.mulf %27, %27 : vector<5x32xf32>
    %cst_24 = arith.constant dense<0.000000e+00> : vector<5xf32>
    %29 = vector.multi_reduction <add>, %28, %cst_24 [1] : vector<5x32xf32> to vector<5xf32>
    %30 = vector.shape_cast %29 : vector<5xf32> to vector<5x1xf32>
    %cst_25 = arith.constant 3.200000e+01 : f32
    %31 = vector.broadcast %cst_25 : f32 to vector<5x1xf32>
    %32 = arith.divf %30, %31 : vector<5x1xf32>
    %cst_26 = arith.constant 9.99999997E-7 : f32
    %33 = vector.broadcast %cst_26 : f32 to vector<5x1xf32>
    %34 = arith.addf %32, %33 : vector<5x1xf32>
    %35 = math.rsqrt %34 : vector<5x1xf32>
    %36 = vector.broadcast %35 : vector<5x1xf32> to vector<5x32xf32>
    %37 = arith.mulf %27, %36 : vector<5x32xf32>
    %38 = vector.broadcast %10 : vector<1x32xf32> to vector<5x32xf32>
    %39 = arith.mulf %37, %38 : vector<5x32xf32>
    %40 = vector.broadcast %11 : vector<1x32xf32> to vector<5x32xf32>
    %41 = arith.addf %39, %40 : vector<5x32xf32>
    %cst_27 = arith.constant dense<0.000000e+00> : vector<5x128xf32>
    %42 = tpu.matmul %41, %12, %cst_27 {dimension_numbers = #tpu.dot_dimension_numbers<[1], [0], [0], [1], [0, 0, 1, 1], [], []>} : vector<5x32xf32>, vector<32x128xf32>, vector<5x128xf32> -> vector<5x128xf32>
    %43 = vector.broadcast %13 : vector<1x128xf32> to vector<5x128xf32>
    %44 = arith.addf %42, %43 : vector<5x128xf32>
    %cst_28 = arith.constant 0.000000e+00 : f32
    %45 = vector.broadcast %cst_28 : f32 to vector<5x32xf32>
    %46 = vector.extract_strided_slice %44 {offsets = [0, 0], sizes = [5, 8], strides = [1, 1]} : vector<5x128xf32> to vector<5x8xf32>
    %47 = vector.extract_strided_slice %44 {offsets = [0, 32], sizes = [5, 8], strides = [1, 1]} : vector<5x128xf32> to vector<5x8xf32>
    %48 = vector.extract_strided_slice %44 {offsets = [0, 64], sizes = [5, 8], strides = [1, 1]} : vector<5x128xf32> to vector<5x8xf32>
    %cst_29 = arith.constant dense<0.000000e+00> : vector<5x5xf32>
    %49 = tpu.matmul %46, %47, %cst_29 {dimension_numbers = #tpu.dot_dimension_numbers<[1], [1], [0], [0], [0, 0, 1, 0], [], []>} : vector<5x8xf32>, vector<5x8xf32>, vector<5x5xf32> -> vector<5x5xf32>
    %cst_30 = arith.constant dense<0xFF800000> : vector<5xf32>
    %50 = vector.multi_reduction <maximumf>, %49, %cst_30 [1] : vector<5x5xf32> to vector<5xf32>
    %51 = vector.shape_cast %50 : vector<5xf32> to vector<5x1xf32>
    %52 = vector.broadcast %51 : vector<5x1xf32> to vector<5x5xf32>
    %53 = arith.subf %49, %52 : vector<5x5xf32>
    %54 = math.exp %53 : vector<5x5xf32>
    %cst_31 = arith.constant dense<0.000000e+00> : vector<5xf32>
    %55 = vector.multi_reduction <add>, %54, %cst_31 [1] : vector<5x5xf32> to vector<5xf32>
    %56 = vector.shape_cast %55 : vector<5xf32> to vector<5x1xf32>
    %57 = tpu.reciprocal %56 {approx = true} : vector<5x1xf32> -> vector<5x1xf32>
    %58 = vector.broadcast %57 : vector<5x1xf32> to vector<5x5xf32>
    %59 = arith.mulf %54, %58 : vector<5x5xf32>
    %cst_32 = arith.constant dense<0.000000e+00> : vector<5x8xf32>
    %60 = tpu.matmul %59, %48, %cst_32 {dimension_numbers = #tpu.dot_dimension_numbers<[1], [0], [0], [1], [0, 0, 1, 1], [], []>} : vector<5x5xf32>, vector<5x8xf32>, vector<5x8xf32> -> vector<5x8xf32>
    %61 = vector.extract_strided_slice %14 {offsets = [0, 0], sizes = [8, 32], strides = [1, 1]} : vector<32x32xf32> to vector<8x32xf32>
    %cst_33 = arith.constant dense<0.000000e+00> : vector<5x32xf32>
    %62 = tpu.matmul %60, %61, %cst_33 {dimension_numbers = #tpu.dot_dimension_numbers<[1], [0], [0], [1], [0, 0, 1, 1], [], []>} : vector<5x8xf32>, vector<8x32xf32>, vector<5x32xf32> -> vector<5x32xf32>
    %63 = arith.addf %45, %62 : vector<5x32xf32>
    %64 = vector.extract_strided_slice %44 {offsets = [0, 8], sizes = [5, 8], strides = [1, 1]} : vector<5x128xf32> to vector<5x8xf32>
    %65 = vector.extract_strided_slice %44 {offsets = [0, 40], sizes = [5, 8], strides = [1, 1]} : vector<5x128xf32> to vector<5x8xf32>
    %66 = vector.extract_strided_slice %44 {offsets = [0, 72], sizes = [5, 8], strides = [1, 1]} : vector<5x128xf32> to vector<5x8xf32>
    %cst_34 = arith.constant dense<0.000000e+00> : vector<5x5xf32>
    %67 = tpu.matmul %64, %65, %cst_34 {dimension_numbers = #tpu.dot_dimension_numbers<[1], [1], [0], [0], [0, 0, 1, 0], [], []>} : vector<5x8xf32>, vector<5x8xf32>, vector<5x5xf32> -> vector<5x5xf32>
    %cst_35 = arith.constant dense<0xFF800000> : vector<5xf32>
    %68 = vector.multi_reduction <maximumf>, %67, %cst_35 [1] : vector<5x5xf32> to vector<5xf32>
    %69 = vector.shape_cast %68 : vector<5xf32> to vector<5x1xf32>
    %70 = vector.broadcast %69 : vector<5x1xf32> to vector<5x5xf32>
    %71 = arith.subf %67, %70 : vector<5x5xf32>
    %72 = math.exp %71 : vector<5x5xf32>
    %cst_36 = arith.constant dense<0.000000e+00> : vector<5xf32>
    %73 = vector.multi_reduction <add>, %72, %cst_36 [1] : vector<5x5xf32> to vector<5xf32>
    %74 = vector.shape_cast %73 : vector<5xf32> to vector<5x1xf32>
    %75 = tpu.reciprocal %74 {approx = true} : vector<5x1xf32> -> vector<5x1xf32>
    %76 = vector.broadcast %75 : vector<5x1xf32> to vector<5x5xf32>
    %77 = arith.mulf %72, %76 : vector<5x5xf32>
    %cst_37 = arith.constant dense<0.000000e+00> : vector<5x8xf32>
    %78 = tpu.matmul %77, %66, %cst_37 {dimension_numbers = #tpu.dot_dimension_numbers<[1], [0], [0], [1], [0, 0, 1, 1], [], []>} : vector<5x5xf32>, vector<5x8xf32>, vector<5x8xf32> -> vector<5x8xf32>
    %79 = vector.extract_strided_slice %14 {offsets = [8, 0], sizes = [8, 32], strides = [1, 1]} : vector<32x32xf32> to vector<8x32xf32>
    %cst_38 = arith.constant dense<0.000000e+00> : vector<5x32xf32>
    %80 = tpu.matmul %78, %79, %cst_38 {dimension_numbers = #tpu.dot_dimension_numbers<[1], [0], [0], [1], [0, 0, 1, 1], [], []>} : vector<5x8xf32>, vector<8x32xf32>, vector<5x32xf32> -> vector<5x32xf32>
    %81 = arith.addf %63, %80 : vector<5x32xf32>
    %82 = vector.extract_strided_slice %44 {offsets = [0, 16], sizes = [5, 8], strides = [1, 1]} : vector<5x128xf32> to vector<5x8xf32>
    %83 = vector.extract_strided_slice %44 {offsets = [0, 48], sizes = [5, 8], strides = [1, 1]} : vector<5x128xf32> to vector<5x8xf32>
    %84 = vector.extract_strided_slice %44 {offsets = [0, 80], sizes = [5, 8], strides = [1, 1]} : vector<5x128xf32> to vector<5x8xf32>
    %cst_39 = arith.constant dense<0.000000e+00> : vector<5x5xf32>
    %85 = tpu.matmul %82, %83, %cst_39 {dimension_numbers = #tpu.dot_dimension_numbers<[1], [1], [0], [0], [0, 0, 1, 0], [], []>} : vector<5x8xf32>, vector<5x8xf32>, vector<5x5xf32> -> vector<5x5xf32>
    %cst_40 = arith.constant dense<0xFF800000> : vector<5xf32>
    %86 = vector.multi_reduction <maximumf>, %85, %cst_40 [1] : vector<5x5xf32> to vector<5xf32>
    %87 = vector.shape_cast %86 : vector<5xf32> to vector<5x1xf32>
    %88 = vector.broadcast %87 : vector<5x1xf32> to vector<5x5xf32>
    %89 = arith.subf %85, %88 : vector<5x5xf32>
    %90 = math.exp %89 : vector<5x5xf32>
    %cst_41 = arith.constant dense<0.000000e+00> : vector<5xf32>
    %91 = vector.multi_reduction <add>, %90, %cst_41 [1] : vector<5x5xf32> to vector<5xf32>
    %92 = vector.shape_cast %91 : vector<5xf32> to vector<5x1xf32>
    %93 = tpu.reciprocal %92 {approx = true} : vector<5x1xf32> -> vector<5x1xf32>
    %94 = vector.broadcast %93 : vector<5x1xf32> to vector<5x5xf32>
    %95 = arith.mulf %90, %94 : vector<5x5xf32>
    %cst_42 = arith.constant dense<0.000000e+00> : vector<5x8xf32>
    %96 = tpu.matmul %95, %84, %cst_42 {dimension_numbers = #tpu.dot_dimension_numbers<[1], [0], [0], [1], [0, 0, 1, 1], [], []>} : vector<5x5xf32>, vector<5x8xf32>, vector<5x8xf32> -> vector<5x8xf32>
    %97 = vector.extract_strided_slice %14 {offsets = [16, 0], sizes = [8, 32], strides = [1, 1]} : vector<32x32xf32> to vector<8x32xf32>
    %cst_43 = arith.constant dense<0.000000e+00> : vector<5x32xf32>
    %98 = tpu.matmul %96, %97, %cst_43 {dimension_numbers = #tpu.dot_dimension_numbers<[1], [0], [0], [1], [0, 0, 1, 1], [], []>} : vector<5x8xf32>, vector<8x32xf32>, vector<5x32xf32> -> vector<5x32xf32>
    %99 = arith.addf %81, %98 : vector<5x32xf32>
    %100 = vector.extract_strided_slice %44 {offsets = [0, 24], sizes = [5, 8], strides = [1, 1]} : vector<5x128xf32> to vector<5x8xf32>
    %101 = vector.extract_strided_slice %44 {offsets = [0, 56], sizes = [5, 8], strides = [1, 1]} : vector<5x128xf32> to vector<5x8xf32>
    %102 = vector.extract_strided_slice %44 {offsets = [0, 88], sizes = [5, 8], strides = [1, 1]} : vector<5x128xf32> to vector<5x8xf32>
    %cst_44 = arith.constant dense<0.000000e+00> : vector<5x5xf32>
    %103 = tpu.matmul %100, %101, %cst_44 {dimension_numbers = #tpu.dot_dimension_numbers<[1], [1], [0], [0], [0, 0, 1, 0], [], []>} : vector<5x8xf32>, vector<5x8xf32>, vector<5x5xf32> -> vector<5x5xf32>
    %cst_45 = arith.constant dense<0xFF800000> : vector<5xf32>
    %104 = vector.multi_reduction <maximumf>, %103, %cst_45 [1] : vector<5x5xf32> to vector<5xf32>
    %105 = vector.shape_cast %104 : vector<5xf32> to vector<5x1xf32>
    %106 = vector.broadcast %105 : vector<5x1xf32> to vector<5x5xf32>
    %107 = arith.subf %103, %106 : vector<5x5xf32>
    %108 = math.exp %107 : vector<5x5xf32>
    %cst_46 = arith.constant dense<0.000000e+00> : vector<5xf32>
    %109 = vector.multi_reduction <add>, %108, %cst_46 [1] : vector<5x5xf32> to vector<5xf32>
    %110 = vector.shape_cast %109 : vector<5xf32> to vector<5x1xf32>
    %111 = tpu.reciprocal %110 {approx = true} : vector<5x1xf32> -> vector<5x1xf32>
    %112 = vector.broadcast %111 : vector<5x1xf32> to vector<5x5xf32>
    %113 = arith.mulf %108, %112 : vector<5x5xf32>
    %cst_47 = arith.constant dense<0.000000e+00> : vector<5x8xf32>
    %114 = tpu.matmul %113, %102, %cst_47 {dimension_numbers = #tpu.dot_dimension_numbers<[1], [0], [0], [1], [0, 0, 1, 1], [], []>} : vector<5x5xf32>, vector<5x8xf32>, vector<5x8xf32> -> vector<5x8xf32>
    %115 = vector.extract_strided_slice %14 {offsets = [24, 0], sizes = [8, 32], strides = [1, 1]} : vector<32x32xf32> to vector<8x32xf32>
    %cst_48 = arith.constant dense<0.000000e+00> : vector<5x32xf32>
    %116 = tpu.matmul %114, %115, %cst_48 {dimension_numbers = #tpu.dot_dimension_numbers<[1], [0], [0], [1], [0, 0, 1, 1], [], []>} : vector<5x8xf32>, vector<8x32xf32>, vector<5x32xf32> -> vector<5x32xf32>
    %117 = arith.addf %99, %116 : vector<5x32xf32>
    %118 = arith.addf %9, %117 : vector<5x32xf32>
    %119 = vector.broadcast %15 : vector<1x32xf32> to vector<5x32xf32>
    %120 = arith.addf %118, %119 : vector<5x32xf32>
    %cst_49 = arith.constant dense<0.000000e+00> : vector<5xf32>
    %121 = vector.multi_reduction <add>, %120, %cst_49 [1] : vector<5x32xf32> to vector<5xf32>
    %122 = vector.shape_cast %121 : vector<5xf32> to vector<5x1xf32>
    %cst_50 = arith.constant 3.200000e+01 : f32
    %123 = vector.broadcast %cst_50 : f32 to vector<5x1xf32>
    %124 = arith.divf %122, %123 : vector<5x1xf32>
    %125 = vector.broadcast %124 : vector<5x1xf32> to vector<5x32xf32>
    %126 = arith.subf %120, %125 : vector<5x32xf32>
    %127 = arith.mulf %126, %126 : vector<5x32xf32>
    %cst_51 = arith.constant dense<0.000000e+00> : vector<5xf32>
    %128 = vector.multi_reduction <add>, %127, %cst_51 [1] : vector<5x32xf32> to vector<5xf32>
    %129 = vector.shape_cast %128 : vector<5xf32> to vector<5x1xf32>
    %cst_52 = arith.constant 3.200000e+01 : f32
    %130 = vector.broadcast %cst_52 : f32 to vector<5x1xf32>
    %131 = arith.divf %129, %130 : vector<5x1xf32>
    %cst_53 = arith.constant 9.99999997E-7 : f32
    %132 = vector.broadcast %cst_53 : f32 to vector<5x1xf32>
    %133 = arith.addf %131, %132 : vector<5x1xf32>
    %134 = math.rsqrt %133 : vector<5x1xf32>
    %135 = vector.broadcast %134 : vector<5x1xf32> to vector<5x32xf32>
    %136 = arith.mulf %126, %135 : vector<5x32xf32>
    %137 = vector.broadcast %16 : vector<1x32xf32> to vector<5x32xf32>
    %138 = arith.mulf %136, %137 : vector<5x32xf32>
    %139 = vector.broadcast %17 : vector<1x32xf32> to vector<5x32xf32>
    %140 = arith.addf %138, %139 : vector<5x32xf32>
    %cst_54 = arith.constant dense<0.000000e+00> : vector<5x128xf32>
    %141 = tpu.matmul %140, %18, %cst_54 {dimension_numbers = #tpu.dot_dimension_numbers<[1], [0], [0], [1], [0, 0, 1, 1], [], []>} : vector<5x32xf32>, vector<32x128xf32>, vector<5x128xf32> -> vector<5x128xf32>
    %142 = vector.broadcast %19 : vector<1x128xf32> to vector<5x128xf32>
    %143 = arith.addf %141, %142 : vector<5x128xf32>
    %cst_55 = arith.constant 5.000000e-01 : f32
    %144 = vector.broadcast %cst_55 : f32 to vector<5x128xf32>
    %145 = arith.mulf %144, %143 : vector<5x128xf32>
    %cst_56 = arith.constant 0.707106769 : f32
    %146 = vector.broadcast %cst_56 : f32 to vector<5x128xf32>
    %147 = arith.mulf %143, %146 : vector<5x128xf32>
    %148 = math.absf %147 : vector<5x128xf32>
    %cst_57 = arith.constant 0.327591091 : f32
    %149 = vector.broadcast %cst_57 : f32 to vector<5x128xf32>
    %150 = arith.mulf %149, %148 : vector<5x128xf32>
    %cst_58 = arith.constant 1.000000e+00 : f32
    %151 = vector.broadcast %cst_58 : f32 to vector<5x128xf32>
    %152 = arith.addf %151, %150 : vector<5x128xf32>
    %153 = tpu.reciprocal %152 {approx = true} : vector<5x128xf32> -> vector<5x128xf32>
    %154 = arith.mulf %152, %153 : vector<5x128xf32>
    %cst_59 = arith.constant 2.000000e+00 : f32
    %155 = vector.broadcast %cst_59 : f32 to vector<5x128xf32>
    %156 = arith.subf %155, %154 : vector<5x128xf32>
    %157 = arith.mulf %153, %156 : vector<5x128xf32>
    %cst_60 = arith.constant 1.06140542 : f32
    %158 = vector.broadcast %cst_60 : f32 to vector<5x128xf32>
    %159 = arith.mulf %158, %157 : vector<5x128xf32>
    %cst_61 = arith.constant 1.45315206 : f32
    %160 = vector.broadcast %cst_61 : f32 to vector<5x128xf32>
    %161 = arith.subf %159, %160 : vector<5x128xf32>
    %162 = arith.mulf %161, %157 : vector<5x128xf32>
    %cst_62 = arith.constant 1.42141378 : f32
    %163 = vector.broadcast %cst_62 : f32 to vector<5x128xf32>
    %164 = arith.addf %162, %163 : vector<5x128xf32>
    %165 = arith.mulf %164, %157 : vector<5x128xf32>
    %cst_63 = arith.constant 0.284496725 : f32
    %166 = vector.broadcast %cst_63 : f32 to vector<5x128xf32>
    %167 = arith.subf %165, %166 : vector<5x128xf32>
    %168 = arith.mulf %167, %157 : vector<5x128xf32>
    %cst_64 = arith.constant 0.254829586 : f32
    %169 = vector.broadcast %cst_64 : f32 to vector<5x128xf32>
    %170 = arith.addf %168, %169 : vector<5x128xf32>
    %171 = arith.mulf %170, %157 : vector<5x128xf32>
    %172 = arith.mulf %147, %147 : vector<5x128xf32>
    %cst_65 = arith.constant 0.000000e+00 : f32
    %173 = vector.broadcast %cst_65 : f32 to vector<5x128xf32>
    %174 = arith.subf %173, %172 : vector<5x128xf32>
    %175 = math.exp %174 : vector<5x128xf32>
    %176 = arith.mulf %171, %175 : vector<5x128xf32>
    %cst_66 = arith.constant 1.000000e+00 : f32
    %177 = vector.broadcast %cst_66 : f32 to vector<5x128xf32>
    %178 = arith.subf %177, %176 : vector<5x128xf32>
    %cst_67 = arith.constant 0.000000e+00 : f32
    %179 = vector.broadcast %cst_67 : f32 to vector<5x128xf32>
    %180 = arith.cmpf oge, %147, %179 : vector<5x128xf32>
    %cst_68 = arith.constant 0.000000e+00 : f32
    %181 = vector.broadcast %cst_68 : f32 to vector<5x128xf32>
    %182 = arith.subf %181, %178 : vector<5x128xf32>
    %183 = arith.select %180, %178, %182 : vector<5x128xi1>, vector<5x128xf32>
    %cst_69 = arith.constant 1.000000e+00 : f32
    %184 = vector.broadcast %cst_69 : f32 to vector<5x128xf32>
    %185 = arith.addf %184, %183 : vector<5x128xf32>
    %186 = arith.mulf %145, %185 : vector<5x128xf32>
    %cst_70 = arith.constant dense<0.000000e+00> : vector<5x32xf32>
    %187 = tpu.matmul %186, %20, %cst_70 {dimension_numbers = #tpu.dot_dimension_numbers<[1], [0], [0], [1], [0, 0, 1, 1], [], []>} : vector<5x128xf32>, vector<128x32xf32>, vector<5x32xf32> -> vector<5x32xf32>
    %188 = vector.broadcast %21 : vector<1x32xf32> to vector<5x32xf32>
    %189 = arith.addf %187, %188 : vector<5x32xf32>
    %190 = arith.addf %120, %189 : vector<5x32xf32>
    %c1064 = arith.constant 1064 : index
    %c0_71 = arith.constant 0 : index
    %191 = vector.load %arg2[%c1064, %c0_71] : memref<1408x128xf32, #tpu.memory_space<vmem>>, vector<1x32xf32>
    %c1072 = arith.constant 1072 : index
    %c0_72 = arith.constant 0 : index
    %192 = vector.load %arg2[%c1072, %c0_72] : memref<1408x128xf32, #tpu.memory_space<vmem>>, vector<1x32xf32>
    %c1080 = arith.constant 1080 : index
    %c0_73 = arith.constant 0 : index
    %193 = vector.load %arg2[%c1080, %c0_73] : memref<1408x128xf32, #tpu.memory_space<vmem>>, vector<32x128xf32>
    %c1112 = arith.constant 1112 : index
    %c0_74 = arith.constant 0 : index
    %194 = vector.load %arg2[%c1112, %c0_74] : memref<1408x128xf32, #tpu.memory_space<vmem>>, vector<1x128xf32>
    %c1120 = arith.constant 1120 : index
    %c0_75 = arith.constant 0 : index
    %195 = vector.load %arg2[%c1120, %c0_75] : memref<1408x128xf32, #tpu.memory_space<vmem>>, vector<32x32xf32>
    %c1152 = arith.constant 1152 : index
    %c0_76 = arith.constant 0 : index
    %196 = vector.load %arg2[%c1152, %c0_76] : memref<1408x128xf32, #tpu.memory_space<vmem>>, vector<1x32xf32>
    %c1160 = arith.constant 1160 : index
    %c0_77 = arith.constant 0 : index
    %197 = vector.load %arg2[%c1160, %c0_77] : memref<1408x128xf32, #tpu.memory_space<vmem>>, vector<1x32xf32>
    %c1168 = arith.constant 1168 : index
    %c0_78 = arith.constant 0 : index
    %198 = vector.load %arg2[%c1168, %c0_78] : memref<1408x128xf32, #tpu.memory_space<vmem>>, vector<1x32xf32>
    %c1176 = arith.constant 1176 : index
    %c0_79 = arith.constant 0 : index
    %199 = vector.load %arg2[%c1176, %c0_79] : memref<1408x128xf32, #tpu.memory_space<vmem>>, vector<32x128xf32>
    %c1208 = arith.constant 1208 : index
    %c0_80 = arith.constant 0 : index
    %200 = vector.load %arg2[%c1208, %c0_80] : memref<1408x128xf32, #tpu.memory_space<vmem>>, vector<1x128xf32>
    %c1216 = arith.constant 1216 : index
    %c0_81 = arith.constant 0 : index
    %201 = vector.load %arg2[%c1216, %c0_81] : memref<1408x128xf32, #tpu.memory_space<vmem>>, vector<128x32xf32>
    %c1344 = arith.constant 1344 : index
    %c0_82 = arith.constant 0 : index
    %202 = vector.load %arg2[%c1344, %c0_82] : memref<1408x128xf32, #tpu.memory_space<vmem>>, vector<1x32xf32>
    %cst_83 = arith.constant dense<0.000000e+00> : vector<5xf32>
    %203 = vector.multi_reduction <add>, %190, %cst_83 [1] : vector<5x32xf32> to vector<5xf32>
    %204 = vector.shape_cast %203 : vector<5xf32> to vector<5x1xf32>
    %cst_84 = arith.constant 3.200000e+01 : f32
    %205 = vector.broadcast %cst_84 : f32 to vector<5x1xf32>
    %206 = arith.divf %204, %205 : vector<5x1xf32>
    %207 = vector.broadcast %206 : vector<5x1xf32> to vector<5x32xf32>
    %208 = arith.subf %190, %207 : vector<5x32xf32>
    %209 = arith.mulf %208, %208 : vector<5x32xf32>
    %cst_85 = arith.constant dense<0.000000e+00> : vector<5xf32>
    %210 = vector.multi_reduction <add>, %209, %cst_85 [1] : vector<5x32xf32> to vector<5xf32>
    %211 = vector.shape_cast %210 : vector<5xf32> to vector<5x1xf32>
    %cst_86 = arith.constant 3.200000e+01 : f32
    %212 = vector.broadcast %cst_86 : f32 to vector<5x1xf32>
    %213 = arith.divf %211, %212 : vector<5x1xf32>
    %cst_87 = arith.constant 9.99999997E-7 : f32
    %214 = vector.broadcast %cst_87 : f32 to vector<5x1xf32>
    %215 = arith.addf %213, %214 : vector<5x1xf32>
    %216 = math.rsqrt %215 : vector<5x1xf32>
    %217 = vector.broadcast %216 : vector<5x1xf32> to vector<5x32xf32>
    %218 = arith.mulf %208, %217 : vector<5x32xf32>
    %219 = vector.broadcast %191 : vector<1x32xf32> to vector<5x32xf32>
    %220 = arith.mulf %218, %219 : vector<5x32xf32>
    %221 = vector.broadcast %192 : vector<1x32xf32> to vector<5x32xf32>
    %222 = arith.addf %220, %221 : vector<5x32xf32>
    %cst_88 = arith.constant dense<0.000000e+00> : vector<5x128xf32>
    %223 = tpu.matmul %222, %193, %cst_88 {dimension_numbers = #tpu.dot_dimension_numbers<[1], [0], [0], [1], [0, 0, 1, 1], [], []>} : vector<5x32xf32>, vector<32x128xf32>, vector<5x128xf32> -> vector<5x128xf32>
    %224 = vector.broadcast %194 : vector<1x128xf32> to vector<5x128xf32>
    %225 = arith.addf %223, %224 : vector<5x128xf32>
    %cst_89 = arith.constant 0.000000e+00 : f32
    %226 = vector.broadcast %cst_89 : f32 to vector<5x32xf32>
    %227 = vector.extract_strided_slice %225 {offsets = [0, 0], sizes = [5, 8], strides = [1, 1]} : vector<5x128xf32> to vector<5x8xf32>
    %228 = vector.extract_strided_slice %225 {offsets = [0, 32], sizes = [5, 8], strides = [1, 1]} : vector<5x128xf32> to vector<5x8xf32>
    %229 = vector.extract_strided_slice %225 {offsets = [0, 64], sizes = [5, 8], strides = [1, 1]} : vector<5x128xf32> to vector<5x8xf32>
    %cst_90 = arith.constant dense<0.000000e+00> : vector<5x5xf32>
    %230 = tpu.matmul %227, %228, %cst_90 {dimension_numbers = #tpu.dot_dimension_numbers<[1], [1], [0], [0], [0, 0, 1, 0], [], []>} : vector<5x8xf32>, vector<5x8xf32>, vector<5x5xf32> -> vector<5x5xf32>
    %cst_91 = arith.constant dense<0xFF800000> : vector<5xf32>
    %231 = vector.multi_reduction <maximumf>, %230, %cst_91 [1] : vector<5x5xf32> to vector<5xf32>
    %232 = vector.shape_cast %231 : vector<5xf32> to vector<5x1xf32>
    %233 = vector.broadcast %232 : vector<5x1xf32> to vector<5x5xf32>
    %234 = arith.subf %230, %233 : vector<5x5xf32>
    %235 = math.exp %234 : vector<5x5xf32>
    %cst_92 = arith.constant dense<0.000000e+00> : vector<5xf32>
    %236 = vector.multi_reduction <add>, %235, %cst_92 [1] : vector<5x5xf32> to vector<5xf32>
    %237 = vector.shape_cast %236 : vector<5xf32> to vector<5x1xf32>
    %238 = tpu.reciprocal %237 {approx = true} : vector<5x1xf32> -> vector<5x1xf32>
    %239 = vector.broadcast %238 : vector<5x1xf32> to vector<5x5xf32>
    %240 = arith.mulf %235, %239 : vector<5x5xf32>
    %cst_93 = arith.constant dense<0.000000e+00> : vector<5x8xf32>
    %241 = tpu.matmul %240, %229, %cst_93 {dimension_numbers = #tpu.dot_dimension_numbers<[1], [0], [0], [1], [0, 0, 1, 1], [], []>} : vector<5x5xf32>, vector<5x8xf32>, vector<5x8xf32> -> vector<5x8xf32>
    %242 = vector.extract_strided_slice %195 {offsets = [0, 0], sizes = [8, 32], strides = [1, 1]} : vector<32x32xf32> to vector<8x32xf32>
    %cst_94 = arith.constant dense<0.000000e+00> : vector<5x32xf32>
    %243 = tpu.matmul %241, %242, %cst_94 {dimension_numbers = #tpu.dot_dimension_numbers<[1], [0], [0], [1], [0, 0, 1, 1], [], []>} : vector<5x8xf32>, vector<8x32xf32>, vector<5x32xf32> -> vector<5x32xf32>
    %244 = arith.addf %226, %243 : vector<5x32xf32>
    %245 = vector.extract_strided_slice %225 {offsets = [0, 8], sizes = [5, 8], strides = [1, 1]} : vector<5x128xf32> to vector<5x8xf32>
    %246 = vector.extract_strided_slice %225 {offsets = [0, 40], sizes = [5, 8], strides = [1, 1]} : vector<5x128xf32> to vector<5x8xf32>
    %247 = vector.extract_strided_slice %225 {offsets = [0, 72], sizes = [5, 8], strides = [1, 1]} : vector<5x128xf32> to vector<5x8xf32>
    %cst_95 = arith.constant dense<0.000000e+00> : vector<5x5xf32>
    %248 = tpu.matmul %245, %246, %cst_95 {dimension_numbers = #tpu.dot_dimension_numbers<[1], [1], [0], [0], [0, 0, 1, 0], [], []>} : vector<5x8xf32>, vector<5x8xf32>, vector<5x5xf32> -> vector<5x5xf32>
    %cst_96 = arith.constant dense<0xFF800000> : vector<5xf32>
    %249 = vector.multi_reduction <maximumf>, %248, %cst_96 [1] : vector<5x5xf32> to vector<5xf32>
    %250 = vector.shape_cast %249 : vector<5xf32> to vector<5x1xf32>
    %251 = vector.broadcast %250 : vector<5x1xf32> to vector<5x5xf32>
    %252 = arith.subf %248, %251 : vector<5x5xf32>
    %253 = math.exp %252 : vector<5x5xf32>
    %cst_97 = arith.constant dense<0.000000e+00> : vector<5xf32>
    %254 = vector.multi_reduction <add>, %253, %cst_97 [1] : vector<5x5xf32> to vector<5xf32>
    %255 = vector.shape_cast %254 : vector<5xf32> to vector<5x1xf32>
    %256 = tpu.reciprocal %255 {approx = true} : vector<5x1xf32> -> vector<5x1xf32>
    %257 = vector.broadcast %256 : vector<5x1xf32> to vector<5x5xf32>
    %258 = arith.mulf %253, %257 : vector<5x5xf32>
    %cst_98 = arith.constant dense<0.000000e+00> : vector<5x8xf32>
    %259 = tpu.matmul %258, %247, %cst_98 {dimension_numbers = #tpu.dot_dimension_numbers<[1], [0], [0], [1], [0, 0, 1, 1], [], []>} : vector<5x5xf32>, vector<5x8xf32>, vector<5x8xf32> -> vector<5x8xf32>
    %260 = vector.extract_strided_slice %195 {offsets = [8, 0], sizes = [8, 32], strides = [1, 1]} : vector<32x32xf32> to vector<8x32xf32>
    %cst_99 = arith.constant dense<0.000000e+00> : vector<5x32xf32>
    %261 = tpu.matmul %259, %260, %cst_99 {dimension_numbers = #tpu.dot_dimension_numbers<[1], [0], [0], [1], [0, 0, 1, 1], [], []>} : vector<5x8xf32>, vector<8x32xf32>, vector<5x32xf32> -> vector<5x32xf32>
    %262 = arith.addf %244, %261 : vector<5x32xf32>
    %263 = vector.extract_strided_slice %225 {offsets = [0, 16], sizes = [5, 8], strides = [1, 1]} : vector<5x128xf32> to vector<5x8xf32>
    %264 = vector.extract_strided_slice %225 {offsets = [0, 48], sizes = [5, 8], strides = [1, 1]} : vector<5x128xf32> to vector<5x8xf32>
    %265 = vector.extract_strided_slice %225 {offsets = [0, 80], sizes = [5, 8], strides = [1, 1]} : vector<5x128xf32> to vector<5x8xf32>
    %cst_100 = arith.constant dense<0.000000e+00> : vector<5x5xf32>
    %266 = tpu.matmul %263, %264, %cst_100 {dimension_numbers = #tpu.dot_dimension_numbers<[1], [1], [0], [0], [0, 0, 1, 0], [], []>} : vector<5x8xf32>, vector<5x8xf32>, vector<5x5xf32> -> vector<5x5xf32>
    %cst_101 = arith.constant dense<0xFF800000> : vector<5xf32>
    %267 = vector.multi_reduction <maximumf>, %266, %cst_101 [1] : vector<5x5xf32> to vector<5xf32>
    %268 = vector.shape_cast %267 : vector<5xf32> to vector<5x1xf32>
    %269 = vector.broadcast %268 : vector<5x1xf32> to vector<5x5xf32>
    %270 = arith.subf %266, %269 : vector<5x5xf32>
    %271 = math.exp %270 : vector<5x5xf32>
    %cst_102 = arith.constant dense<0.000000e+00> : vector<5xf32>
    %272 = vector.multi_reduction <add>, %271, %cst_102 [1] : vector<5x5xf32> to vector<5xf32>
    %273 = vector.shape_cast %272 : vector<5xf32> to vector<5x1xf32>
    %274 = tpu.reciprocal %273 {approx = true} : vector<5x1xf32> -> vector<5x1xf32>
    %275 = vector.broadcast %274 : vector<5x1xf32> to vector<5x5xf32>
    %276 = arith.mulf %271, %275 : vector<5x5xf32>
    %cst_103 = arith.constant dense<0.000000e+00> : vector<5x8xf32>
    %277 = tpu.matmul %276, %265, %cst_103 {dimension_numbers = #tpu.dot_dimension_numbers<[1], [0], [0], [1], [0, 0, 1, 1], [], []>} : vector<5x5xf32>, vector<5x8xf32>, vector<5x8xf32> -> vector<5x8xf32>
    %278 = vector.extract_strided_slice %195 {offsets = [16, 0], sizes = [8, 32], strides = [1, 1]} : vector<32x32xf32> to vector<8x32xf32>
    %cst_104 = arith.constant dense<0.000000e+00> : vector<5x32xf32>
    %279 = tpu.matmul %277, %278, %cst_104 {dimension_numbers = #tpu.dot_dimension_numbers<[1], [0], [0], [1], [0, 0, 1, 1], [], []>} : vector<5x8xf32>, vector<8x32xf32>, vector<5x32xf32> -> vector<5x32xf32>
    %280 = arith.addf %262, %279 : vector<5x32xf32>
    %281 = vector.extract_strided_slice %225 {offsets = [0, 24], sizes = [5, 8], strides = [1, 1]} : vector<5x128xf32> to vector<5x8xf32>
    %282 = vector.extract_strided_slice %225 {offsets = [0, 56], sizes = [5, 8], strides = [1, 1]} : vector<5x128xf32> to vector<5x8xf32>
    %283 = vector.extract_strided_slice %225 {offsets = [0, 88], sizes = [5, 8], strides = [1, 1]} : vector<5x128xf32> to vector<5x8xf32>
    %cst_105 = arith.constant dense<0.000000e+00> : vector<5x5xf32>
    %284 = tpu.matmul %281, %282, %cst_105 {dimension_numbers = #tpu.dot_dimension_numbers<[1], [1], [0], [0], [0, 0, 1, 0], [], []>} : vector<5x8xf32>, vector<5x8xf32>, vector<5x5xf32> -> vector<5x5xf32>
    %cst_106 = arith.constant dense<0xFF800000> : vector<5xf32>
    %285 = vector.multi_reduction <maximumf>, %284, %cst_106 [1] : vector<5x5xf32> to vector<5xf32>
    %286 = vector.shape_cast %285 : vector<5xf32> to vector<5x1xf32>
    %287 = vector.broadcast %286 : vector<5x1xf32> to vector<5x5xf32>
    %288 = arith.subf %284, %287 : vector<5x5xf32>
    %289 = math.exp %288 : vector<5x5xf32>
    %cst_107 = arith.constant dense<0.000000e+00> : vector<5xf32>
    %290 = vector.multi_reduction <add>, %289, %cst_107 [1] : vector<5x5xf32> to vector<5xf32>
    %291 = vector.shape_cast %290 : vector<5xf32> to vector<5x1xf32>
    %292 = tpu.reciprocal %291 {approx = true} : vector<5x1xf32> -> vector<5x1xf32>
    %293 = vector.broadcast %292 : vector<5x1xf32> to vector<5x5xf32>
    %294 = arith.mulf %289, %293 : vector<5x5xf32>
    %cst_108 = arith.constant dense<0.000000e+00> : vector<5x8xf32>
    %295 = tpu.matmul %294, %283, %cst_108 {dimension_numbers = #tpu.dot_dimension_numbers<[1], [0], [0], [1], [0, 0, 1, 1], [], []>} : vector<5x5xf32>, vector<5x8xf32>, vector<5x8xf32> -> vector<5x8xf32>
    %296 = vector.extract_strided_slice %195 {offsets = [24, 0], sizes = [8, 32], strides = [1, 1]} : vector<32x32xf32> to vector<8x32xf32>
    %cst_109 = arith.constant dense<0.000000e+00> : vector<5x32xf32>
    %297 = tpu.matmul %295, %296, %cst_109 {dimension_numbers = #tpu.dot_dimension_numbers<[1], [0], [0], [1], [0, 0, 1, 1], [], []>} : vector<5x8xf32>, vector<8x32xf32>, vector<5x32xf32> -> vector<5x32xf32>
    %298 = arith.addf %280, %297 : vector<5x32xf32>
    %299 = arith.addf %190, %298 : vector<5x32xf32>
    %300 = vector.broadcast %196 : vector<1x32xf32> to vector<5x32xf32>
    %301 = arith.addf %299, %300 : vector<5x32xf32>
    %cst_110 = arith.constant dense<0.000000e+00> : vector<5xf32>
    %302 = vector.multi_reduction <add>, %301, %cst_110 [1] : vector<5x32xf32> to vector<5xf32>
    %303 = vector.shape_cast %302 : vector<5xf32> to vector<5x1xf32>
    %cst_111 = arith.constant 3.200000e+01 : f32
    %304 = vector.broadcast %cst_111 : f32 to vector<5x1xf32>
    %305 = arith.divf %303, %304 : vector<5x1xf32>
    %306 = vector.broadcast %305 : vector<5x1xf32> to vector<5x32xf32>
    %307 = arith.subf %301, %306 : vector<5x32xf32>
    %308 = arith.mulf %307, %307 : vector<5x32xf32>
    %cst_112 = arith.constant dense<0.000000e+00> : vector<5xf32>
    %309 = vector.multi_reduction <add>, %308, %cst_112 [1] : vector<5x32xf32> to vector<5xf32>
    %310 = vector.shape_cast %309 : vector<5xf32> to vector<5x1xf32>
    %cst_113 = arith.constant 3.200000e+01 : f32
    %311 = vector.broadcast %cst_113 : f32 to vector<5x1xf32>
    %312 = arith.divf %310, %311 : vector<5x1xf32>
    %cst_114 = arith.constant 9.99999997E-7 : f32
    %313 = vector.broadcast %cst_114 : f32 to vector<5x1xf32>
    %314 = arith.addf %312, %313 : vector<5x1xf32>
    %315 = math.rsqrt %314 : vector<5x1xf32>
    %316 = vector.broadcast %315 : vector<5x1xf32> to vector<5x32xf32>
    %317 = arith.mulf %307, %316 : vector<5x32xf32>
    %318 = vector.broadcast %197 : vector<1x32xf32> to vector<5x32xf32>
    %319 = arith.mulf %317, %318 : vector<5x32xf32>
    %320 = vector.broadcast %198 : vector<1x32xf32> to vector<5x32xf32>
    %321 = arith.addf %319, %320 : vector<5x32xf32>
    %cst_115 = arith.constant dense<0.000000e+00> : vector<5x128xf32>
    %322 = tpu.matmul %321, %199, %cst_115 {dimension_numbers = #tpu.dot_dimension_numbers<[1], [0], [0], [1], [0, 0, 1, 1], [], []>} : vector<5x32xf32>, vector<32x128xf32>, vector<5x128xf32> -> vector<5x128xf32>
    %323 = vector.broadcast %200 : vector<1x128xf32> to vector<5x128xf32>
    %324 = arith.addf %322, %323 : vector<5x128xf32>
    %cst_116 = arith.constant 5.000000e-01 : f32
    %325 = vector.broadcast %cst_116 : f32 to vector<5x128xf32>
    %326 = arith.mulf %325, %324 : vector<5x128xf32>
    %cst_117 = arith.constant 0.707106769 : f32
    %327 = vector.broadcast %cst_117 : f32 to vector<5x128xf32>
    %328 = arith.mulf %324, %327 : vector<5x128xf32>
    %329 = math.absf %328 : vector<5x128xf32>
    %cst_118 = arith.constant 0.327591091 : f32
    %330 = vector.broadcast %cst_118 : f32 to vector<5x128xf32>
    %331 = arith.mulf %330, %329 : vector<5x128xf32>
    %cst_119 = arith.constant 1.000000e+00 : f32
    %332 = vector.broadcast %cst_119 : f32 to vector<5x128xf32>
    %333 = arith.addf %332, %331 : vector<5x128xf32>
    %334 = tpu.reciprocal %333 {approx = true} : vector<5x128xf32> -> vector<5x128xf32>
    %335 = arith.mulf %333, %334 : vector<5x128xf32>
    %cst_120 = arith.constant 2.000000e+00 : f32
    %336 = vector.broadcast %cst_120 : f32 to vector<5x128xf32>
    %337 = arith.subf %336, %335 : vector<5x128xf32>
    %338 = arith.mulf %334, %337 : vector<5x128xf32>
    %cst_121 = arith.constant 1.06140542 : f32
    %339 = vector.broadcast %cst_121 : f32 to vector<5x128xf32>
    %340 = arith.mulf %339, %338 : vector<5x128xf32>
    %cst_122 = arith.constant 1.45315206 : f32
    %341 = vector.broadcast %cst_122 : f32 to vector<5x128xf32>
    %342 = arith.subf %340, %341 : vector<5x128xf32>
    %343 = arith.mulf %342, %338 : vector<5x128xf32>
    %cst_123 = arith.constant 1.42141378 : f32
    %344 = vector.broadcast %cst_123 : f32 to vector<5x128xf32>
    %345 = arith.addf %343, %344 : vector<5x128xf32>
    %346 = arith.mulf %345, %338 : vector<5x128xf32>
    %cst_124 = arith.constant 0.284496725 : f32
    %347 = vector.broadcast %cst_124 : f32 to vector<5x128xf32>
    %348 = arith.subf %346, %347 : vector<5x128xf32>
    %349 = arith.mulf %348, %338 : vector<5x128xf32>
    %cst_125 = arith.constant 0.254829586 : f32
    %350 = vector.broadcast %cst_125 : f32 to vector<5x128xf32>
    %351 = arith.addf %349, %350 : vector<5x128xf32>
    %352 = arith.mulf %351, %338 : vector<5x128xf32>
    %353 = arith.mulf %328, %328 : vector<5x128xf32>
    %cst_126 = arith.constant 0.000000e+00 : f32
    %354 = vector.broadcast %cst_126 : f32 to vector<5x128xf32>
    %355 = arith.subf %354, %353 : vector<5x128xf32>
    %356 = math.exp %355 : vector<5x128xf32>
    %357 = arith.mulf %352, %356 : vector<5x128xf32>
    %cst_127 = arith.constant 1.000000e+00 : f32
    %358 = vector.broadcast %cst_127 : f32 to vector<5x128xf32>
    %359 = arith.subf %358, %357 : vector<5x128xf32>
    %cst_128 = arith.constant 0.000000e+00 : f32
    %360 = vector.broadcast %cst_128 : f32 to vector<5x128xf32>
    %361 = arith.cmpf oge, %328, %360 : vector<5x128xf32>
    %cst_129 = arith.constant 0.000000e+00 : f32
    %362 = vector.broadcast %cst_129 : f32 to vector<5x128xf32>
    %363 = arith.subf %362, %359 : vector<5x128xf32>
    %364 = arith.select %361, %359, %363 : vector<5x128xi1>, vector<5x128xf32>
    %cst_130 = arith.constant 1.000000e+00 : f32
    %365 = vector.broadcast %cst_130 : f32 to vector<5x128xf32>
    %366 = arith.addf %365, %364 : vector<5x128xf32>
    %367 = arith.mulf %326, %366 : vector<5x128xf32>
    %cst_131 = arith.constant dense<0.000000e+00> : vector<5x32xf32>
    %368 = tpu.matmul %367, %201, %cst_131 {dimension_numbers = #tpu.dot_dimension_numbers<[1], [0], [0], [1], [0, 0, 1, 1], [], []>} : vector<5x128xf32>, vector<128x32xf32>, vector<5x32xf32> -> vector<5x32xf32>
    %369 = vector.broadcast %202 : vector<1x32xf32> to vector<5x32xf32>
    %370 = arith.addf %368, %369 : vector<5x32xf32>
    %371 = arith.addf %301, %370 : vector<5x32xf32>
    %372 = vector.extract_strided_slice %371 {offsets = [0, 0], sizes = [1, 32], strides = [1, 1]} : vector<5x32xf32> to vector<1x32xf32>
    %cst_132 = arith.constant dense<0.000000e+00> : vector<1xf32>
    %373 = vector.multi_reduction <add>, %372, %cst_132 [1] : vector<1x32xf32> to vector<1xf32>
    %374 = vector.shape_cast %373 : vector<1xf32> to vector<1x1xf32>
    %cst_133 = arith.constant 3.200000e+01 : f32
    %375 = vector.broadcast %cst_133 : f32 to vector<1x1xf32>
    %376 = arith.divf %374, %375 : vector<1x1xf32>
    %377 = vector.broadcast %376 : vector<1x1xf32> to vector<1x32xf32>
    %378 = arith.subf %372, %377 : vector<1x32xf32>
    %379 = arith.mulf %378, %378 : vector<1x32xf32>
    %cst_134 = arith.constant dense<0.000000e+00> : vector<1xf32>
    %380 = vector.multi_reduction <add>, %379, %cst_134 [1] : vector<1x32xf32> to vector<1xf32>
    %381 = vector.shape_cast %380 : vector<1xf32> to vector<1x1xf32>
    %cst_135 = arith.constant 3.200000e+01 : f32
    %382 = vector.broadcast %cst_135 : f32 to vector<1x1xf32>
    %383 = arith.divf %381, %382 : vector<1x1xf32>
    %cst_136 = arith.constant 9.99999997E-7 : f32
    %384 = vector.broadcast %cst_136 : f32 to vector<1x1xf32>
    %385 = arith.addf %383, %384 : vector<1x1xf32>
    %386 = math.rsqrt %385 : vector<1x1xf32>
    %387 = vector.broadcast %386 : vector<1x1xf32> to vector<1x32xf32>
    %388 = arith.mulf %378, %387 : vector<1x32xf32>
    %389 = arith.mulf %388, %2 : vector<1x32xf32>
    %390 = arith.addf %389, %3 : vector<1x32xf32>
    %cst_137 = arith.constant dense<0.000000e+00> : vector<1x128xf32>
    %391 = tpu.matmul %390, %4, %cst_137 {dimension_numbers = #tpu.dot_dimension_numbers<[1], [0], [0], [1], [0, 0, 1, 1], [], []>} : vector<1x32xf32>, vector<32x128xf32>, vector<1x128xf32> -> vector<1x128xf32>
    %392 = arith.addf %391, %5 : vector<1x128xf32>
    %c0_138 = arith.constant 0 : index
    %c0_139 = arith.constant 0 : index
    %c0_140 = arith.constant 0 : index
    %393 = vector.load %arg3[%c0_138, %c0_139, %c0_140] : memref<1x1x128xf32, #tpu.memory_space<vmem>>, vector<1x1x128xf32>
    %394 = vector.shape_cast %393 : vector<1x1x128xf32> to vector<1x128xf32>
    %395 = vector.shape_cast %392 : vector<1x128xf32> to vector<1x1x128xf32>
    tpu.vector_store %arg3[%c0_138, %c0_139, %c0_140], %395 {strides = array<i32>} : memref<1x1x128xf32, #tpu.memory_space<vmem>>, vector<1x1x128xf32>,
    return
  }
  func.func @transform_0(%arg0: i32) -> (i32, i32, i32, i32) {
    %c0_i32 = arith.constant 0 : i32
    %c0_i32_0 = arith.constant 0 : i32
    %c0_i32_1 = arith.constant 0 : i32
    %c0_i32_2 = arith.constant 0 : i32
    return %arg0, %c0_i32, %c0_i32_0, %c0_i32_1 : i32, i32, i32, i32
  }
  func.func @transform_1(%arg0: i32) -> (i32, i32) {
    %c0_i32 = arith.constant 0 : i32
    %c0_i32_0 = arith.constant 0 : i32
    %c0_i32_1 = arith.constant 0 : i32
    return %c0_i32, %c0_i32_0 : i32, i32
  }
  func.func @transform_2(%arg0: i32) -> (i32, i32, i32) {
    %c0_i32 = arith.constant 0 : i32
    %c0_i32_0 = arith.constant 0 : i32
    %c0_i32_1 = arith.constant 0 : i32
    return %arg0, %c0_i32, %c0_i32_0 : i32, i32, i32
  }
}

</mosaic_0001>

<bundles_post_ra>
// kernel: vit_forward.1
= control target key start
LH: loop header
LB: loop body
LE: loop exit
PB: predicated region body
PF: predicated region fallthrough
CT: control target
= control target key end

     0   :  { %7 = vsyncpa [#allocation3], 0  ;;  %s5026_s0 = inlined_call_operand.vmem [shape: f32[2,1,5,768], index: 0, kind: input, shape index: {}]   ;;  %s5027_s1 = inlined_call_operand.vmem [shape: f32[1408,128], index: 1, kind: input, shape index: {}]   ;;  %s5028_s2 = inlined_call_operand.hbm [shape: f32[2,1,128], index: 2, kind: output, shape index: {}]  }
   0x1   :  { %9 = vsyncpa [#allocation3 + $0x1], 0  ;;  %s4134_s9 = smov 0   ;;  %s4136_s10 = smov 0  }
   0x2   :  { %s4138_s11 = smov 0   ;;  %s4140_s12 = smov 0  }
   0x3 LB: > { %s4155_s13 = sadd.s32 4294967295, %s4102_s12   ;;  %s3232_s14 = sadd.s32 4294967294, %s4102_s12   ;;  %s4102_s12 = sphi %s4140_s12, %s5034_s12   ;;  %s4098_s11 = sphi %s4138_s11, %s5033_s11   ;;  %s4094_s10 = sphi %s4136_s10, %s5032_s10   ;;  %s4090_s9 = sphi %s4134_s9, %s5031_s9  }
   0x4   : > { %s4159_s15 = sadd.s32 1, %s4102_s12   ;;  %s69_s16 = sadd.s32 1, %s4098_s11 }
   0x5   : > { %s66_s17 = ssub.s32 %s4102_s12, %s4159_s15  ;;  %p79_p0 = scmp.ne.s32.totalorder %s4098_s11, %s4094_s10 }
   0x6   : > { %p67_p1 = scmp.eq.s32.totalorder %s66_s17, 0  ;;  %p80_p2 = scmp.eq.s32.totalorder %s4155_s13, 1 }
   0x7   : > { %p85_p3 = scmp.ne.s32.totalorder %s4094_s10, %s4090_s9  ;;  %p86_p4 = scmp.eq.s32.totalorder %s3232_s14, 1 }
   0x8   : > { %s4170_s18 = scalar_select %p67_p1, %s4098_s11, %s69_s16  }
   0x9   : > { %p4172_p5 = por %p80_p2, %p79_p0  ;;  %p4176_p6 = por %p86_p4, %p85_p3 }
   0xa   : > { %p3235_p7 = scmp.ge.s32.totalorder %s4102_s12, 1  ;;  %p115_p8 = scmp.lt.s32.totalorder %s4102_s12, 3 }
   0xc   : > { %p116_p9 = pnand %p3235_p7, %p115_p8 }
   0xd   : > { %v157_v0 = vld [vmem:[%s5027_s1 + $0x80] sm:$0xff] (!%p116_p9)  ;;  %v158_v1 = vld [vmem:[%s5027_s1 + $0x88] sm:$0xff] (!%p116_p9)  ;;  %v159_v11 = vld [vmem:[%s5027_s1 + $0x90] sm:$0xff] (!%p116_p9)  ;;  %p136_p10 = scmp.lt.s32.totalorder (!%p116_p9), %s4155_s13, 1  ;;  %vm497_vm0 = vcmask (!%p116_p9), 258048   ;;  %vm4105_vm1 = vmmov (!%p116_p9), 0  }
   0xe   : > { %119 = sbr.rel (%p116_p9) target bundleno = 8719 (0x220f), region = 28  ;;  %v141_v2 = vld [vmem:[%s5027_s1] sm:$0xff] (!%p116_p9)  ;;  %v3762_v3 = vpack.c.bf16 (!%p116_p9), %v158_v1, %v157_v0  ;;  %v142_v4 = vld [vmem:[%s5027_s1 + $0x8] sm:$0xff] (!%p116_p9)  ;;  %v160_v13 = vld [vmem:[%s5027_s1 + $0x98] sm:$0xff] (!%p116_p9)  ;;  %vm526_vm2 = vcmask (!%p116_p9), 261120   ;;  %s4107_s4 = smov (!%p116_p9), 64  }
   0xf   : > { %v189_v5 = vld [vmem:[%s5027_s1 + $0x180] sm:$0xff] (!%p116_p9)  ;;  %v190_v6 = vld [vmem:[%s5027_s1 + $0x188] sm:$0xff] (!%p116_p9)  ;;  %v3764_v7 = vpack.c.bf16 (!%p116_p9), %v142_v4, %v141_v2  ;;  %v143_v14 = vld [vmem:[%s5027_s1 + $0x10] sm:$0xff] (!%p116_p9)  ;;  %v3766_v16 = vpack.c.bf16 (!%p116_p9), %v160_v13, %v159_v11  ;;  %s4108_s5 = smov (!%p116_p9), 96   ;;  %s4109_s6 = smov (!%p116_p9), 88   ;;  %vm603_vm3 = vcmask (!%p116_p9), 64512  }
  0x10   : > { %v3794_v8 = vpack.c.bf16 (!%p116_p9), %v190_v6, %v189_v5  ;;  %v173_v9 = vld [vmem:[%s5027_s1 + $0x100] sm:$0xff] (!%p116_p9)  ;;  %v174_v10 = vld [vmem:[%s5027_s1 + $0x108] sm:$0xff] (!%p116_p9)  ;;  %3763 = vmatprep.subr.bf16.mxu0 (!%p116_p9), %v3762_v3  ;;  %v144_v15 = vld [vmem:[%s5027_s1 + $0x18] sm:$0xff] (!%p116_p9)  ;;  %vm696_vm4 = vcmask (!%p116_p9), 1044480   ;;  %vm678_vm5 = vcmask (!%p116_p9), 36864   ;;  %vm692_vm6 = vcmask (!%p116_p9), 39936  }
  0x11   : > { %v3796_v12 = vpack.c.bf16 (!%p116_p9), %v174_v10, %v173_v9  ;;  %3765 = vmatpush3.bf16.msra.mxu0 (!%p116_p9), %v3764_v7  ;;  %v3768_v17 = vpack.c.bf16 (!%p116_p9), %v144_v15, %v143_v14  ;;  %v191_v18 = vld [vmem:[%s5027_s1 + $0x190] sm:$0xff] (!%p116_p9)  ;;  %v192_v19 = vld [vmem:[%s5027_s1 + $0x198] sm:$0xff] (!%p116_p9)  ;;  %v161_v23 = vld [vmem:[%s5027_s1 + $0xa0] sm:$0xff] (!%p116_p9)  ;;  %s4113_s7 = smov (!%p116_p9), 56   ;;  %s4114_s8 = smov (!%p116_p9), 48   ;;  %vm3074_vm9 = vcmask (!%p116_p9), 253952  }
  0x12   : > { %3795 = vmatprep.subr.bf16.mxu1 (!%p116_p9), %v3794_v8  ;;  %v175_v20 = vld [vmem:[%s5027_s1 + $0x110] sm:$0xff] (!%p116_p9)  ;;  %v3798_v21 = vpack.c.bf16 (!%p116_p9), %v192_v19, %v191_v18  ;;  %v176_v22 = vld [vmem:[%s5027_s1 + $0x118] sm:$0xff] (!%p116_p9)  ;;  %v162_v24 = vld [vmem:[%s5027_s1 + $0xa8] sm:$0xff] (!%p116_p9)  ;;  %3767 = vmatprep.subr.bf16.mxu0 (!%p116_p9), %v3766_v16  ;;  %s4115_s14 = smov (!%p116_p9), 104   ;;  %s4116_s16 = smov (!%p116_p9), 72  }
  0x13   : > { %3797 = vmatpush3.bf16.msra.mxu1 (!%p116_p9), %v3796_v12  ;;  %v3800_v25 = vpack.c.bf16 (!%p116_p9), %v176_v22, %v175_v20  ;;  %v3770_v26 = vpack.c.bf16 (!%p116_p9), %v162_v24, %v161_v23  ;;  %v145_v27 = vld [vmem:[%s5027_s1 + $0x20] sm:$0xff] (!%p116_p9)  ;;  %v146_v28 = vld [vmem:[%s5027_s1 + $0x28] sm:$0xff] (!%p116_p9)  ;;  %v163_v35 = vld [vmem:[%s5027_s1 + $0xb0] sm:$0xff] (!%p116_p9)  ;;  %s4117_s29 = smov (!%p116_p9), 40   ;;  %s134_s22 = sand.u32 (!%p116_p9), 1, %s4094_s10  }
  0x14   : > { %v193_v29 = vld [vmem:[%s5027_s1 + $0x1a0] sm:$0xff] (!%p116_p9)  ;;  %3799 = vmatprep.subr.bf16.mxu1 (!%p116_p9), %v3798_v21  ;;  %v194_v30 = vld [vmem:[%s5027_s1 + $0x1a8] sm:$0xff] (!%p116_p9)  ;;  %v3772_v33 = vpack.c.bf16 (!%p116_p9), %v146_v28, %v145_v27  ;;  %v164_v36 = vld [vmem:[%s5027_s1 + $0xb8] sm:$0xff] (!%p116_p9)  ;;  %s3302_s28 = sshll.u32 (!%p116_p9), %s4155_s13, 4  ;;  %s135_s30 = scalar_lea.vmem (!%p116_p9), [#allocation2], %s134_s22 }
  0x15   : > { %v177_v31 = vld [vmem:[%s5027_s1 + $0x120] sm:$0xff]  ;;  %v178_v32 = vld [vmem:[%s5027_s1 + $0x128] sm:$0xff]  ;;  %3769 = vmatpush3.bf16.msra.mxu0 %v3768_v17  ;;  %v3802_v34 = vpack.c.bf16 %v194_v30, %v193_v29  ;;  %v147_v37 = vld [vmem:[%s5027_s1 + $0x30] sm:$0xff]  ;;  %v3774_v39 = vpack.c.bf16 %v164_v36, %v163_v35  ;;  %s4276_s24 = scalar_select %p136_p10, %s4155_s13, 1 }
  0x16   : > { %3771 = vmatprep.subr.bf16.mxu0 %v3770_v26  ;;  %v3804_v38 = vpack.c.bf16 %v178_v32, %v177_v31  ;;  %v148_v40 = vld [vmem:[%s5027_s1 + $0x38] sm:$0xff]  ;;  %v195_v41 = vld [vmem:[%s5027_s1 + $0x1b0] sm:$0xff]  ;;  %v165_v46 = vld [vmem:[%s5027_s1 + $0xc0] sm:$0xff]  ;;  %s3177_s3 = sshll.u32 %s135_s30, 4  ;;  %s4118_s13 = smov [#allocation2]   ;;  %s4986_s3 = int_to_ptr.vmem [resolvable:$true] %s3177_s3 }
  0x17   : > { %3801 = vmatpush3.bf16.msra.mxu1 %v3800_v25  ;;  %v196_v42 = vld [vmem:[%s5027_s1 + $0x1b8] sm:$0xff]  ;;  %v179_v44 = vld [vmem:[%s5027_s1 + $0x130] sm:$0xff]  ;;  %v166_v47 = vld [vmem:[%s5027_s1 + $0xc8] sm:$0xff]  ;;  %v3776_v48 = vpack.c.bf16 %v148_v40, %v147_v37  ;;  %s3936_s25 = smul.u32 48, %s4276_s24  ;;  %s4111_s24 = smov 120  }
  0x18   : > { %3803 = vmatprep.subr.bf16.mxu1 %v3802_v34  ;;  %v3806_v43 = vpack.c.bf16 %v196_v42, %v195_v41  ;;  %v180_v45 = vld [vmem:[%s5027_s1 + $0x138] sm:$0xff]  ;;  %v197_v49 = vld [vmem:[%s5027_s1 + $0x1c0] sm:$0xff]  ;;  %v198_v50 = vld [vmem:[%s5027_s1 + $0x1c8] sm:$0xff]  ;;  %v3778_v52 = vpack.c.bf16 %v166_v47, %v165_v46 }
  0x19   : > { %3773 = vmatpush3.bf16.msra.mxu0 %v3772_v33  ;;  %v3808_v51 = vpack.c.bf16 %v180_v45, %v179_v44  ;;  %v149_v53 = vld [vmem:[%s5027_s1 + $0x40] sm:$0xff]  ;;  %v150_v54 = vld [vmem:[%s5027_s1 + $0x48] sm:$0xff]  ;;  %v3810_v56 = vpack.c.bf16 %v198_v50, %v197_v49  ;;  %v167_v58 = vld [vmem:[%s5027_s1 + $0xd0] sm:$0xff]  ;;  %s4333_s26 = scalar_lea.vmem %s5026_s0, %s3936_s25  ;;  %s4110_s25 = smov 80  }
  0x1a   : > { %3775 = vmatprep.subr.bf16.mxu0 %v3774_v39  ;;  %v181_v55 = vld [vmem:[%s5027_s1 + $0x140] sm:$0xff]  ;;  %v182_v57 = vld [vmem:[%s5027_s1 + $0x148] sm:$0xff]  ;;  %v168_v59 = vld [vmem:[%s5027_s1 + $0xd8] sm:$0xff]  ;;  %v3780_v62 = vpack.c.bf16 %v150_v54, %v149_v53 }
  0x1b   : > { %3805 = vmatpush3.bf16.msra.mxu1 %v3804_v38  ;;  %v199_v60 = vld [vmem:[%s5027_s1 + $0x1d0] sm:$0xff]  ;;  %v200_v61 = vld [vmem:[%s5027_s1 + $0x1d8] sm:$0xff]  ;;  %v3812_v63 = vpack.c.bf16 %v182_v57, %v181_v55  ;;  %v3782_v0 = vpack.c.bf16 %v168_v59, %v167_v58  ;;  %v169_v6 = vld [vmem:[%s5027_s1 + $0xe0] sm:$0xff] }
  0x1c   : > { %3807 = vmatprep.subr.bf16.mxu1 %v3806_v43  ;;  %v151_v1 = vld [vmem:[%s5027_s1 + $0x50] sm:$0xff]  ;;  %v152_v2 = vld [vmem:[%s5027_s1 + $0x58] sm:$0xff]  ;;  %v3814_v4 = vpack.c.bf16 %v200_v61, %v199_v60  ;;  %v170_v7 = vld [vmem:[%s5027_s1 + $0xe8] sm:$0xff] }
  0x1d   : > { %3777 = vmatpush3.bf16.msra.mxu0 %v3776_v48  ;;  %v183_v3 = vld [vmem:[%s5027_s1 + $0x150] sm:$0xff]  ;;  %v184_v5 = vld [vmem:[%s5027_s1 + $0x158] sm:$0xff]  ;;  %v201_v8 = vld [vmem:[%s5027_s1 + $0x1e0] sm:$0xff]  ;;  %v3784_v10 = vpack.c.bf16 %v152_v2, %v151_v1  ;;  %v3786_v14 = vpack.c.bf16 %v170_v7, %v169_v6 }
  0x1e   : > { %3779 = vmatprep.subr.bf16.mxu0 %v3778_v52  ;;  %v202_v9 = vld [vmem:[%s5027_s1 + $0x1e8] sm:$0xff]  ;;  %v153_v11 = vld [vmem:[%s5027_s1 + $0x60] sm:$0xff]  ;;  %v3816_v13 = vpack.c.bf16 %v184_v5, %v183_v3  ;;  %v171_v19 = vld [vmem:[%s5027_s1 + $0xf0] sm:$0xff] }
  0x1f   : > { %3809 = vmatpush3.bf16.msra.mxu1 %v3808_v51  ;;  %v246_v12 = vld [vmem:[%s4333_s26 + $0x8] sm:$0x1f]  ;;  %v185_v16 = vld [vmem:[%s5027_s1 + $0x160] sm:$0xff]  ;;  %v3818_v18 = vpack.c.bf16 %v202_v9, %v201_v8  ;;  %v172_v20 = vld [vmem:[%s5027_s1 + $0xf8] sm:$0xff] }
  0x20   : > { %3811 = vmatprep.subr.bf16.mxu1 %v3810_v56  ;;  %v154_v15 = vld [vmem:[%s5027_s1 + $0x68] sm:$0xff]  ;;  %315 = vmatprep.mubr.f32.mxu0 %v246_v12  ;;  %v248_v21 = vld [vmem:[%s4333_s26 + $0x18] sm:$0x1f]  ;;  %v203_v22 = vld [vmem:[%s5027_s1 + $0x1f0] sm:$0xff]  ;;  %v3790_v26 = vpack.c.bf16 %v172_v20, %v171_v19 }
  0x21   : > { %3781 = vmatpush3.bf16.msra.mxu0 %v3780_v62  ;;  %v186_v17 = vld [vmem:[%s5027_s1 + $0x168] sm:$0xff]  ;;  %v204_v23 = vld [vmem:[%s5027_s1 + $0x1f8] sm:$0xff]  ;;  %385 = vmatprep.mubr.f32.mxu1 %v248_v21  ;;  %v3788_v24 = vpack.c.bf16 %v154_v15, %v153_v11  ;;  %v155_v27 = vld [vmem:[%s5027_s1 + $0x70] sm:$0xff] }
  0x22   : > { %3783 = vmatprep.subr.bf16.mxu0 %v3782_v0  ;;  %v3820_v25 = vpack.c.bf16 %v186_v17, %v185_v16  ;;  %v156_v28 = vld [vmem:[%s5027_s1 + $0x78] sm:$0xff]  ;;  %v187_v29 = vld [vmem:[%s5027_s1 + $0x170] sm:$0xff]  ;;  %v3822_v30 = vpack.c.bf16 %v204_v23, %v203_v22  ;;  %v221_v32 = vld [vmem:[%s5027_s1 + $0x280] sm:$0xff] }
  0x23   : > { %3813 = vmatpush3.bf16.msra.mxu1 %v3812_v63  ;;  %v188_v31 = vld [vmem:[%s5027_s1 + $0x178] sm:$0xff]  ;;  %v222_v33 = vld [vmem:[%s5027_s1 + $0x288] sm:$0xff]  ;;  %v3792_v34 = vpack.c.bf16 %v156_v28, %v155_v27  ;;  %v205_v37 = vld [vmem:[%s5027_s1 + $0x200] sm:$0xff] }
  0x24   : > { %3815 = vmatprep.subr.bf16.mxu1 %v3814_v4  ;;  %v3824_v35 = vpack.c.bf16 %v188_v31, %v187_v29  ;;  %v3826_v36 = vpack.c.bf16 %v222_v33, %v221_v32  ;;  %v206_v38 = vld [vmem:[%s5027_s1 + $0x208] sm:$0xff]  ;;  %v223_v39 = vld [vmem:[%s5027_s1 + $0x290] sm:$0xff]  ;;  %v224_v40 = vld [vmem:[%s5027_s1 + $0x298] sm:$0xff] }
  0x25   : > { %3785 = vmatpush3.bf16.msra.mxu0 %v3784_v10  ;;  %v245_v41 = vld [vmem:[%s4333_s26] sm:$0x1f]  ;;  %v3828_v42 = vpack.c.bf16 %v206_v38, %v205_v37  ;;  %v247_v43 = vld [vmem:[%s4333_s26 + $0x10] sm:$0x1f]  ;;  %v3830_v44 = vpack.c.bf16 %v224_v40, %v223_v39  ;;  %v208_v46 = vld [vmem:[%s5027_s1 + $0x218] sm:$0xff] }
  0x26   : > { %3787 = vmatprep.subr.bf16.mxu0 %v3786_v14  ;;  %v207_v45 = vld [vmem:[%s5027_s1 + $0x210] sm:$0xff]  ;;  %v225_v47 = vld [vmem:[%s5027_s1 + $0x2a0] sm:$0xff]  ;;  %v226_v48 = vld [vmem:[%s5027_s1 + $0x2a8] sm:$0xff] }
  0x27   : > { %3817 = vmatpush3.bf16.msra.mxu1 %v3816_v13  ;;  %v250_v49 = vld [vmem:[%s4333_s26 + $0x28] sm:$0x1f]  ;;  %v3832_v50 = vpack.c.bf16 %v208_v46, %v207_v45  ;;  %v3834_v51 = vpack.c.bf16 %v226_v48, %v225_v47  ;;  %v209_v52 = vld [vmem:[%s5027_s1 + $0x220] sm:$0xff]  ;;  %v227_v54 = vld [vmem:[%s5027_s1 + $0x2b0] sm:$0xff]  ;;  %v4106_v48 = vmov 0.0  }
  0x28   : > { %3819 = vmatprep.subr.bf16.mxu1 %v3818_v18  ;;  %v210_v53 = vld [vmem:[%s5027_s1 + $0x228] sm:$0xff]  ;;  %v228_v55 = vld [vmem:[%s5027_s1 + $0x2b8] sm:$0xff]  ;;  %v211_v58 = vld [vmem:[%s5027_s1 + $0x230] sm:$0xff] }
  0x29   : > { %3789 = vmatpush3.bf16.msra.mxu0 %v3788_v24  ;;  %v3836_v56 = vpack.c.bf16 %v210_v53, %v209_v52  ;;  %v3838_v57 = vpack.c.bf16 %v228_v55, %v227_v54  ;;  %v212_v59 = vld [vmem:[%s5027_s1 + $0x238] sm:$0xff]  ;;  %v229_v60 = vld [vmem:[%s5027_s1 + $0x2c0] sm:$0xff]  ;;  %v230_v61 = vld [vmem:[%s5027_s1 + $0x2c8] sm:$0xff] }
  0x2a   : > { %3791 = vmatprep.subr.bf16.mxu0 %v3790_v26  ;;  %v3840_v62 = vpack.c.bf16 %v212_v59, %v211_v58  ;;  %v3842_v63 = vpack.c.bf16 %v230_v61, %v229_v60  ;;  %v213_v0 = vld [vmem:[%s5027_s1 + $0x240] sm:$0xff]  ;;  %v214_v1 = vld [vmem:[%s5027_s1 + $0x248] sm:$0xff]  ;;  %v231_v2 = vld [vmem:[%s5027_s1 + $0x2d0] sm:$0xff] }
  0x2b   : > { %3821 = vmatpush3.bf16.msra.mxu1 %v3820_v25  ;;  %v232_v3 = vld [vmem:[%s5027_s1 + $0x2d8] sm:$0xff]  ;;  %v3844_v4 = vpack.c.bf16 %v214_v1, %v213_v0  ;;  %v215_v6 = vld [vmem:[%s5027_s1 + $0x250] sm:$0xff]  ;;  %v233_v8 = vld [vmem:[%s5027_s1 + $0x2e0] sm:$0xff] }
  0x2c   : > { %3823 = vmatprep.subr.bf16.mxu1 %v3822_v30  ;;  %v3846_v5 = vpack.c.bf16 %v232_v3, %v231_v2  ;;  %v216_v7 = vld [vmem:[%s5027_s1 + $0x258] sm:$0xff]  ;;  %v234_v9 = vld [vmem:[%s5027_s1 + $0x2e8] sm:$0xff]  ;;  %v217_v12 = vld [vmem:[%s5027_s1 + $0x260] sm:$0xff] }
  0x2d   : > { %3793 = vmatpush3.bf16.msra.mxu0 %v3792_v34  ;;  %v3848_v10 = vpack.c.bf16 %v216_v7, %v215_v6  ;;  %v3850_v11 = vpack.c.bf16 %v234_v9, %v233_v8  ;;  %v218_v13 = vld [vmem:[%s5027_s1 + $0x268] sm:$0xff]  ;;  %v235_v14 = vld [vmem:[%s5027_s1 + $0x2f0] sm:$0xff]  ;;  %v236_v15 = vld [vmem:[%s5027_s1 + $0x2f8] sm:$0xff] }
  0x2e   : > { %3827 = vmatprep.subr.bf16.mxu0 %v3826_v36  ;;  %v3852_v16 = vpack.c.bf16 %v218_v13, %v217_v12  ;;  %v3854_v17 = vpack.c.bf16 %v236_v15, %v235_v14  ;;  %v219_v18 = vld [vmem:[%s5027_s1 + $0x270] sm:$0xff]  ;;  %v220_v19 = vld [vmem:[%s5027_s1 + $0x278] sm:$0xff]  ;;  %v249_v21 = vld [vmem:[%s4333_s26 + $0x20] sm:$0x1f]  ;;  %s4112_s26 = smov 112  }
  0x2f   : > { %3825 = vmatpush3.bf16.msra.mxu1 %v3824_v35  ;;  %v3856_v20 = vpack.c.bf16 %v220_v19, %v219_v18  ;;  %v237_v23 = vld [vmem:[%s5027_s1 + $0x300] sm:$0x1f]  ;;  %v465_v45 = vld [vmem:[%s5027_s1 + $0x328] sm:$0xff]  ;;  %v466_v46 = vld [vmem:[%s5027_s1 + $0x330] sm:$0xff] }
  0x30   : > { %316 = vmatmul.mubr.f32.vlgmr.msra.gmra.mrb[0].mxu0 %v245_v41  ;;  %v463_v41 = vld [vmem:[%s5027_s1 + $0x318] sm:$0xff]  ;;  %v3862_v47 = vpack.c.bf16 %v466_v46, %v465_v45  ;;  %3528 = vmatprep.subr.mxu1 %v4106_v48  ;;  %v3237_v53 = vld [vmem:[%s5027_s1 + $0x308] ss:$0 sm:$0xff]  ;;  %v3238_v55 = vld [vmem:[%s5027_s1 + $0x310] ss:$0 sm:$0xff] }
  0x31   : > { %3829 = vmatpush3.bf16.msra.mxu0 %v3828_v42  ;;  %455 = vmatprep.mubr.f32.mxu0 %v250_v49  ;;  %v464_v42 = vld [vmem:[%s5027_s1 + $0x320] sm:$0xff]  ;;  %v3239_v58 = vld [vmem:[%s5027_s1 + $0x338] ss:$0 sm:$0xff] }
  0x32   : > { %386 = vmatmul.mubr.f32.vlgmr.msra.gmra.mrb[0].mxu1 %v247_v43  ;;  %3831 = vmatprep.subr.bf16.mxu0 %v3830_v44  ;;  %v3859_v43 = vpack.c.bf16 %v464_v42, %v463_v41  ;;  %v4104_v44 = vmov 0.0|0.0  }
  0x33   : > { %3530 = vmatprep.mubr.msk.f32.mxu1 %vm4105_vm1, %v4106_v48 }
  0x35   : > { %3833 = vmatpush3.bf16.msra.mxu0 %v3832_v50 }
  0x36   : > { %3835 = vmatprep.subr.bf16.mxu0 %v3834_v51 }
  0x39   : > { %3837 = vmatpush3.bf16.msra.mxu0 %v3836_v56 }
  0x3a   : > { %3839 = vmatprep.subr.bf16.mxu0 %v3838_v57 }
  0x3d   : > { %3841 = vmatpush3.bf16.msra.mxu0 %v3840_v62 }
  0x3e   : > { %3843 = vmatprep.subr.bf16.mxu0 %v3842_v63 }
  0x41   : > { %3845 = vmatpush3.bf16.msra.mxu0 %v3844_v4 }
  0x42   : > { %3847 = vmatprep.subr.bf16.mxu0 %v3846_v5 }
  0x45   : > { %3849 = vmatpush3.bf16.msra.mxu0 %v3848_v10 }
  0x46   : > { %3851 = vmatprep.subr.bf16.mxu0 %v3850_v11 }
  0x49   : > { %3853 = vmatpush3.bf16.msra.mxu0 %v3852_v16 }
  0x4a   : > { %3855 = vmatprep.subr.bf16.mxu0 %v3854_v17 }
  0x4d   : > { %3857 = vmatpush3.bf16.msra.mxu0 %v3856_v20 }
  0x4e   : > { %3858 = vmatprep.subr.bf16.mxu0 %v4104_v44 }
  0x50   : > { %456 = vmatmul.mubr.f32.vlgmr.msra.gmra.mrb[2].mxu0 %v249_v21 }
  0x51   : > { %3860 = vmatpush3.bf16.msra.mxu0 %v3859_v43  ;;  %3525 = vmatprep.mubr.msk.f32.mxu0 %vm4105_vm1, %v4106_v48 }
  0x52   : > { %3861 = vmatprep.subr.bf16.mxu0 %v4104_v44 }
  0x55   : > { %3863 = vmatpush3.bf16.msra.mxu0 %v3862_v47 }
  0x56   : > { %3558 = vmatprep.subr.mxu0 %v4106_v48 }
 0x103   : > { %v3337_v22 = vpop.f32.mrb[0].mxu0 }
 0x104   : > { %v3338_v24 = vpop.f32.mrb[1].mxu0 }
 0x105   : > { %v3372_v25 = vpop.f32.mrb[0].mxu1  ;;  %v3339_v26 = vadd.f32 %v3338_v24, %v3337_v22 }
 0x106   : > { %v3373_v27 = vpop.f32.mrb[1].mxu1 }
 0x107   : > { %v3374_v28 = vadd.f32 %v3373_v27, %v3372_v25  ;;  %v318_v29 = vadd.f32 %v3339_v26, %v237_v23 }
 0x109   : > { %v388_v30 = vadd.f32 %v3374_v28, %v318_v29 }
 0x123   : > { %v3407_v31 = vpop.f32.mrb[2].mxu0 }
 0x124   : > { %v3408_v32 = vpop.f32.mrb[3].mxu0 }
 0x125   : > { %v3409_v33 = vadd.f32 %v3408_v32, %v3407_v31 }
 0x127   : > { %v4491_v34 = vadd.f32 %v3409_v33, %v388_v30 }
 0x129   : > { %v498_v35 = vsel %vm497_vm0, %v4491_v34, 0.0 }
 0x12a   : > { %499 = vadd.xlane.f32.xlu0 %v498_v35 }
 0x1b7   : > { %v500_v36 = vpop.xlane.xlu0 %499 }
 0x1b8   : > { %v502_v37 = vmul.f32 0.03125, %v500_v36 }
 0x1ba   : > { %v503_v38 = vsub.f32 %v4491_v34, %v502_v37 }
 0x1bc   : > { %v504_v39 = vmul.f32 %v503_v38, %v503_v38 }
 0x1be   : > { %v505_v40 = vsel %vm497_vm0, %v504_v39, 0.0 }
 0x1bf   : > { %506 = vadd.xlane.f32.xlu0 %v505_v40  ;;  %v468_v40 = vld [vmem:[%s5027_s1 + $0x340] sm:$0xff] }
 0x24c   : > { %v507_v49 = vpop.xlane.xlu0 %506 }
 0x24d   : > { %v508_v50 = vmul.f32 0.03125, %v507_v49 }
 0x24f   : > { %v509_v51 = vadd.f32 1e-06, %v508_v50  ;;  %v470_v50 = vld [vmem:[%s5027_s1 + $0x350] sm:$0xff] }
 0x251   : > { %3990 = vrsqrt.f32 %v509_v51 }
 0x25b   : > { %v3991_v52 = vpop.eup %3990 }
 0x25c   : > { %v511_v54 = vmul.f32 %v3991_v52, %v503_v38  ;;  %v469_v38 = vld [vmem:[%s5027_s1 + $0x348] sm:$0xff] }
 0x25e   : > { %v516_v56 = vmul.f32 %v3237_v53, %v511_v54 }
 0x260   : > { %v521_v57 = vadd.f32 %v3238_v55, %v516_v56 }
 0x262   : > { %3526 = vmatmul.mubr.msk.f32.vlgmr.msra.gmra.mrb[4].mxu0 %vm526_vm2, %v521_v57 }
 0x263   : > { %3560 = vmatprep.mubr.msk.f32.mxu0 %vm4105_vm1, %v4106_v48 }
 0x335   : > { %v596_v59 = vpop.f32.mrb[4].mxu0 }
 0x336   : > { %v4529_v60 = vadd.f32 %v3239_v58, %v596_v59  ;;  %v3527_v61 = vpop.f32.mrb[5].mxu0 }
 0x338   : > { %690 = vrot.lane.b32.xlu0 %v4529_v60, %s4107_s4  ;;  %601 = vrot.lane.b32.xlu1 %v4529_v60, %s4108_s5 }
 0x33c   : > { %771 = vrot.lane.b32.xlu0 %v4529_v60, %s4109_s6 }
 0x3aa   : > { %v602_v62 = vpop.permute.xlu1 %601  ;;  %v691_v63 = vpop.permute.xlu0 %690 }
 0x3ab   : > { %3529 = vmatpush3.xpose.msk.msra.mxu1 %vm603_vm3, %v602_v62 }
 0x3ac   : > { %3533 = vmatprep.subr.mxu1 %v4106_v48 }
 0x3ae   : > { %3531 = vmatmul.mubr.msk.f32.vlgmr.msra.gmra.mrb[2].mxu1 %vm603_vm3, %v4529_v60  ;;  %v772_v9 = vpop.permute.xlu0 %771 }
 0x3af   : > { %3534 = vmatpush3.msk.msra.mxu1 %vm696_vm4, %v691_v63  ;;  %3535 = vmatprep.mubr.msk.f32.mxu1 %vm4105_vm1, %v4106_v48 }
 0x3b0   : > { %3538 = vmatprep.subr.mxu1 %v4106_v48 }
 0x481   : > { %v674_v0 = vpop.f32.mrb[2].mxu1 }
 0x482   : > { %v3532_v1 = vpop.f32.mrb[3].mxu1  ;;  %v679_v2 = vsel %vm678_vm5, %v674_v0, -inf }
 0x483   : > { %680 = vmax.xlane.f32.xlu1 %v679_v2 }
 0x494   : > { %1083 = vrot.lane.b32.xlu1 %v4529_v60, %s4110_s25 }
 0x510   : > { %v681_v3 = vpop.xlane.xlu1 %680 }
 0x511   : > { %v682_v4 = vsub.f32 %v674_v0, %v681_v3 }
 0x513   : > { %v683_v5 = vmul.f32 1.442695, %v682_v4  ;;  %v471_v4 = vld [vmem:[%s5027_s1 + $0x358] sm:$0xff] }
 0x514   : > { %v1084_v6 = vpop.permute.xlu1 %1083 }
 0x515   : > { %3992 = vpow2.f32 %v683_v5  ;;  %3559 = vmatpush3.xpose.msk.msra.mxu0 %vm603_vm3, %v1084_v6 }
 0x516   : > { %3568 = vmatprep.subr.mxu0 %v4106_v48 }
 0x51f   : > { %v3993_v7 = vpop.eup %3992 }
 0x520   : > { %v685_v8 = vsel %vm678_vm5, %v3993_v7, 0.0 }
 0x521   : > { %686 = vadd.xlane.f32.xlu0 %v685_v8 }
 0x537   : > { %769 = vrot.lane.b32.xlu0 %v4529_v60, %s4111_s24 }
 0x53b   : > { %1081 = vrot.lane.b32.xlu0 %v4529_v60, %s4112_s26 }
 0x5ae   : > { %v687_v10 = vpop.xlane.xlu0 %686 }
 0x5af   : > { %3994 = vrcp.f32 %v687_v10 }
 0x5b2   : > { %v770_v11 = vpop.permute.xlu0 %769 }
 0x5b6   : > { %v1082_v12 = vpop.permute.xlu0 %1081 }
 0x5b7   : > { %3561 = vmatmul.mubr.msk.f32.vlgmr.msra.gmra.mrb[6].mxu0 %vm603_vm3, %v1082_v12 }
 0x5b8   : > { %3570 = vmatprep.mubr.msk.f32.mxu0 %vm4105_vm1, %v4106_v48  ;;  %3569 = vmatpush3.msra.mxu0 %v470_v50  ;;  %v486_v50 = vld [vmem:[%s5027_s1 + $0x3d0] sm:$0xff] }
 0x5b9   : > { %v3995_v13 = vpop.eup %3994  ;;  %3578 = vmatprep.subr.mxu0 %v4106_v48 }
 0x5ba   : > { %v689_v14 = vmul.f32 %v3995_v13, %v3993_v7 }
 0x5bc   : > { %3536 = vmatmul.mubr.msk.f32.vlgmr.msra.gmra.mrb[4].mxu1 %vm692_vm6, %v689_v14 }
 0x5bd   : > { %3539 = vmatpush3.xpose.msk.msra.mxu1 %vm603_vm3, %v772_v9  ;;  %3540 = vmatprep.mubr.msk.f32.mxu1 %vm4105_vm1, %v4106_v48 }
 0x5be   : > { %3543 = vmatprep.subr.mxu1 %v4106_v48 }
 0x5c0   : > { %3541 = vmatmul.mubr.msk.f32.vlgmr.msra.gmra.mrb[6].mxu1 %vm603_vm3, %v770_v11 }
 0x5c1   : > { %3545 = vmatprep.mubr.msk.f32.mxu1 %vm4105_vm1, %v4106_v48 }
 0x68a   : > { %v1155_v15 = vpop.f32.mrb[6].mxu0 }
 0x68b   : > { %v3562_v16 = vpop.f32.mrb[7].mxu0  ;;  %v1159_v28 = vsel %vm678_vm5, %v1155_v15, -inf }
 0x68f   : > { %v765_v17 = vpop.f32.mrb[4].mxu1 }
 0x690   : > { %v3537_v18 = vpop.f32.mrb[5].mxu1 }
 0x693   : > { %v843_v19 = vpop.f32.mrb[6].mxu1 }
 0x694   : > { %v3542_v20 = vpop.f32.mrb[7].mxu1  ;;  %v847_v21 = vsel %vm678_vm5, %v843_v19, -inf }
 0x695   : > { %848 = vmax.xlane.f32.xlu0 %v847_v21 }
 0x6ab   : > { %858 = vrot.lane.b32.xlu0 %v4529_v60, %s4113_s7 }
 0x6af   : > { %1170 = vrot.lane.b32.xlu0 %v4529_v60, %s4114_s8 }
 0x6b3   : > { %1321 = vrot.lane.b32.xlu0 %v4529_v60, %s4115_s14 }
 0x722   : > { %v849_v22 = vpop.xlane.xlu0 %848 }
 0x723   : > { %v850_v23 = vsub.f32 %v843_v19, %v849_v22 }
 0x725   : > { %v851_v24 = vmul.f32 1.442695, %v850_v23 }
 0x726   : > { %v859_v25 = vpop.permute.xlu0 %858 }
 0x727   : > { %3996 = vpow2.f32 %v851_v24  ;;  %3544 = vmatpush3.msk.msra.mxu1 %vm696_vm4, %v859_v25  ;;  %v475_v24 = vld [vmem:[%s5027_s1 + $0x378] sm:$0xff] }
 0x728   : > { %3548 = vmatprep.subr.mxu1 %v4106_v48 }
 0x72a   : > { %v1171_v45 = vpop.permute.xlu0 %1170 }
 0x72e   : > { %v1322_v49 = vpop.permute.xlu0 %1321 }
 0x731   : > { %v3997_v26 = vpop.eup %3996 }
 0x732   : > { %v853_v27 = vsel %vm678_vm5, %v3997_v26, 0.0 }
 0x733   : > { %854 = vadd.xlane.f32.xlu1 %v853_v27  ;;  %v478_v27 = vld [vmem:[%s5027_s1 + $0x390] sm:$0xff] }
 0x737   : > { %1160 = vmax.xlane.f32.xlu1 %v1159_v28 }
 0x7c0   : > { %v855_v29 = vpop.xlane.xlu1 %854 }
 0x7c1   : > { %3998 = vrcp.f32 %v855_v29 }
 0x7c4   : > { %v1161_v30 = vpop.xlane.xlu1 %1160 }
 0x7c5   : > { %v1162_v31 = vsub.f32 %v1155_v15, %v1161_v30  ;;  %v3261_v15 = vld [vmem:[%s5027_s1 + $0x360] ss:$0 sm:$0xff] }
 0x7c7   : > { %v1163_v32 = vmul.f32 1.442695, %v1162_v31 }
 0x7c9   : > { %4000 = vpow2.f32 %v1163_v32 }
 0x7cb   : > { %v3999_v33 = vpop.eup %3998 }
 0x7cc   : > { %v857_v35 = vmul.f32 %v3999_v33, %v3997_v26  ;;  %v477_v26 = vld [vmem:[%s5027_s1 + $0x388] sm:$0xff] }
 0x7cd   : > { %v3868_v28 = vpack.c.bf16 %v478_v27, %v477_v26  ;;  %v3262_v33 = vld [vmem:[%s5027_s1 + $0x368] ss:$0 sm:$0xff] }
 0x7ce   : > { %3546 = vmatmul.mubr.msk.f32.vlgmr.msra.gmra.mrb[8].mxu1 %vm692_vm6, %v857_v35 }
 0x7cf   : > { %3550 = vmatprep.mubr.msk.f32.mxu1 %vm4105_vm1, %v4106_v48  ;;  %3549 = vmatpush3.msra.mxu1 %v469_v38 }
 0x7d0   : > { %3553 = vmatprep.subr.mxu1 %v4106_v48 }
 0x7d3   : > { %v4001_v36 = vpop.eup %4000 }
 0x7d4   : > { %v1165_v37 = vsel %vm678_vm5, %v4001_v36, 0.0 }
 0x7d5   : > { %1166 = vadd.xlane.f32.xlu1 %v1165_v37 }
 0x7e6   : > { %1323 = vrot.lane.b32.xlu1 %v4529_v60, %s4116_s16 }
 0x862   : > { %v1167_v39 = vpop.xlane.xlu1 %1166 }
 0x863   : > { %4002 = vrcp.f32 %v1167_v39  ;;  %v480_v39 = vld [vmem:[%s5027_s1 + $0x3a0] sm:$0xff] }
 0x866   : > { %v1324_v47 = vpop.permute.xlu1 %1323 }
 0x86d   : > { %v4003_v43 = vpop.eup %4002 }
 0x86e   : > { %v1169_v46 = vmul.f32 %v4003_v43, %v4001_v36  ;;  %v3263_v36 = vld [vmem:[%s5027_s1 + $0x370] ss:$0 sm:$0xff]  ;;  %v483_v43 = vld [vmem:[%s5027_s1 + $0x3b8] sm:$0xff] }
 0x8a1   : > { %v931_v41 = vpop.f32.mrb[8].mxu1 }
 0x8a2   : > { %v3547_v42 = vpop.f32.mrb[9].mxu1  ;;  %3551 = vmatmul.mubr.msk.f32.vlgmr.msra.gmra.mrb[10].mxu1 %vm603_vm3, %v931_v41 }
 0x8a3   : > { %3554 = vmatpush3.msra.mxu1 %v468_v40  ;;  %3555 = vmatprep.mubr.msk.f32.mxu1 %vm4105_vm1, %v4106_v48  ;;  %v481_v40 = vld [vmem:[%s5027_s1 + $0x3a8] sm:$0xff]  ;;  %v482_v42 = vld [vmem:[%s5027_s1 + $0x3b0] sm:$0xff] }
 0x8a4   : > { %3563 = vmatprep.subr.mxu1 %v4106_v48  ;;  %v3871_v41 = vpack.c.bf16 %v481_v40, %v480_v39 }
 0x8a6   : > { %3556 = vmatmul.mubr.msk.f32.vlgmr.msra.gmra.mrb[12].mxu1 %vm603_vm3, %v765_v17 }
 0x8a7   : > { %3564 = vmatpush3.msk.msra.mxu1 %vm696_vm4, %v1171_v45  ;;  %3565 = vmatprep.mubr.msk.f32.mxu1 %vm4105_vm1, %v4106_v48  ;;  %v3874_v45 = vpack.c.bf16 %v483_v43, %v482_v42 }
 0x8a8   : > { %3573 = vmatprep.subr.mxu1 %v4106_v48 }
 0x8aa   : > { %3566 = vmatmul.mubr.msk.f32.vlgmr.msra.gmra.mrb[14].mxu1 %vm692_vm6, %v1169_v46  ;;  %v484_v46 = vld [vmem:[%s5027_s1 + $0x3c0] sm:$0xff] }
 0x8ab   : > { %3575 = vmatprep.mubr.msk.f32.mxu1 %vm4105_vm1, %v4106_v48 }
 0x8ae   : > { %3574 = vmatpush3.xpose.msk.msra.mxu1 %vm603_vm3, %v1324_v47  ;;  %v485_v47 = vld [vmem:[%s5027_s1 + $0x3c8] sm:$0xff] }
 0x8af   : > { %3583 = vmatprep.subr.mxu1 %v4106_v48 }
 0x8b1   : > { %3576 = vmatmul.mubr.msk.f32.vlgmr.msra.gmra.mrb[16].mxu1 %vm603_vm3, %v1322_v49  ;;  %v3877_v49 = vpack.c.bf16 %v485_v47, %v484_v46  ;;  %v1773_v46 = vld [vmem:[%s5027_s1 + $0x438] sm:$0xff] }
 0x8b2   : > { %3585 = vmatprep.mubr.msk.f32.mxu1 %vm4105_vm1, %v4106_v48  ;;  %3584 = vmatpush3.msra.mxu1 %v471_v4 }
 0x8b3   : > { %3870 = vmatprep.subr.bf16.mxu1 %v4104_v44 }
 0x975   : > { %v1004_v51 = vpop.f32.mrb[10].mxu1 }
 0x976   : > { %v3552_v52 = vpop.f32.mrb[11].mxu1 }
 0x979   : > { %v1077_v53 = vpop.f32.mrb[12].mxu1 }
 0x97a   : > { %v1078_v54 = vadd.f32 %v1077_v53, %v1004_v51  ;;  %v3557_v55 = vpop.f32.mrb[13].mxu1  ;;  %v487_v51 = vld [vmem:[%s5027_s1 + $0x3d8] sm:$0xff]  ;;  %v488_v53 = vld [vmem:[%s5027_s1 + $0x3e0] sm:$0xff] }
 0x97b   : > { %v3880_v52 = vpack.c.bf16 %v487_v51, %v486_v50  ;;  %v1776_v50 = vld [vmem:[%s5027_s1 + $0x450] sm:$0xff] }
 0x97d   : > { %v1243_v56 = vpop.f32.mrb[14].mxu1 }
 0x97e   : > { %v3567_v57 = vpop.f32.mrb[15].mxu1  ;;  %3571 = vmatmul.mubr.msk.f32.vlgmr.msra.gmra.mrb[8].mxu0 %vm603_vm3, %v1243_v56  ;;  %v490_v56 = vld [vmem:[%s5027_s1 + $0x3f0] sm:$0xff] }
 0x97f   : > { %3580 = vmatprep.mubr.msk.f32.mxu0 %vm4105_vm1, %v4106_v48  ;;  %v491_v57 = vld [vmem:[%s5027_s1 + $0x3f8] sm:$0xff] }
 0x984   : > { %v1395_v58 = vpop.f32.mrb[16].mxu1 }
 0x985   : > { %v3577_v59 = vpop.f32.mrb[17].mxu1  ;;  %v1399_v61 = vsel %vm678_vm5, %v1395_v58, -inf }
 0x986   : > { %1400 = vmax.xlane.f32.xlu0 %v1399_v61  ;;  %v492_v59 = vld [vmem:[%s5027_s1 + $0x400] sm:$0xff]  ;;  %v493_v61 = vld [vmem:[%s5027_s1 + $0x408] sm:$0xff] }
 0x99c   : > { %1410 = vrot.lane.b32.xlu0 %v4529_v60, %s4117_s29 }
 0xa13   : > { %v1401_v62 = vpop.xlane.xlu0 %1400 }
 0xa14   : > { %v1402_v63 = vsub.f32 %v1395_v58, %v1401_v62  ;;  %v3886_v58 = vpack.c.bf16 %v491_v57, %v490_v56  ;;  %v3889_v62 = vpack.c.bf16 %v493_v61, %v492_v59  ;;  %v3269_v56 = vld [vmem:[%s5027_s1 + $0x428] ss:$0 sm:$0xff] }
 0xa16   : > { %v1403_v0 = vmul.f32 1.442695, %v1402_v63  ;;  %v494_v63 = vld [vmem:[%s5027_s1 + $0x410] sm:$0xff] }
 0xa17   : > { %v1411_v1 = vpop.permute.xlu0 %1410 }
 0xa18   : > { %4004 = vpow2.f32 %v1403_v0  ;;  %3579 = vmatpush3.msk.msra.mxu0 %vm696_vm4, %v1411_v1  ;;  %v495_v0 = vld [vmem:[%s5027_s1 + $0x418] sm:$0xff] }
 0xa19   : > { %3864 = vmatprep.subr.bf16.mxu0 %v4104_v44  ;;  %v3892_v1 = vpack.c.bf16 %v495_v0, %v494_v63 }
 0xa22   : > { %v4005_v2 = vpop.eup %4004 }
 0xa23   : > { %v1405_v3 = vsel %vm678_vm5, %v4005_v2, 0.0 }
 0xa24   : > { %1406 = vadd.xlane.f32.xlu1 %v1405_v3 }
 0xa51   : > { %v1316_v60 = vpop.f32.mrb[8].mxu0 }
 0xa52   : > { %v1320_v5 = vadd.f32 %v1316_v60, %v1078_v54  ;;  %v3572_v6 = vpop.f32.mrb[9].mxu0  ;;  %v489_v54 = vld [vmem:[%s5027_s1 + $0x3e8] sm:$0xff] }
 0xa53   : > { %v3883_v55 = vpack.c.bf16 %v489_v54, %v488_v53 }
 0xab1   : > { %v1407_v7 = vpop.xlane.xlu1 %1406 }
 0xab2   : > { %4006 = vrcp.f32 %v1407_v7 }
 0xabc   : > { %v4007_v8 = vpop.eup %4006 }
 0xabd   : > { %v1409_v9 = vmul.f32 %v4007_v8, %v4005_v2  ;;  %v3264_v2 = vld [vmem:[%s5027_s1 + $0x398] ss:$0 sm:$0xff] }
 0xabf   : > { %3581 = vmatmul.mubr.msk.f32.vlgmr.msra.gmra.mrb[10].mxu0 %vm692_vm6, %v1409_v9 }
 0xac0   : > { %3596 = vmatprep.mubr.msk.f32.mxu0 %vm4105_vm1, %v4106_v48 }
 0xb92   : > { %v1483_v10 = vpop.f32.mrb[10].mxu0 }
 0xb93   : > { %v3582_v11 = vpop.f32.mrb[11].mxu0  ;;  %3586 = vmatmul.mubr.msk.f32.vlgmr.msra.gmra.mrb[18].mxu1 %vm603_vm3, %v1483_v10 }
 0xb94   : > { %3631 = vmatprep.mubr.msk.f32.mxu1 %vm4105_vm1, %v4106_v48  ;;  %3872 = vmatpush3.bf16.msra.mxu1 %v3871_v41 }
 0xb95   : > { %3873 = vmatprep.subr.bf16.mxu1 %v4104_v44 }
 0xb98   : > { %3875 = vmatpush3.bf16.msra.mxu1 %v3874_v45 }
 0xb99   : > { %3876 = vmatprep.subr.bf16.mxu1 %v4104_v44 }
 0xb9c   : > { %3878 = vmatpush3.bf16.msra.mxu1 %v3877_v49  ;;  %v1775_v49 = vld [vmem:[%s5027_s1 + $0x448] sm:$0xff] }
 0xb9d   : > { %3879 = vmatprep.subr.bf16.mxu1 %v4104_v44  ;;  %v3898_v51 = vpack.c.bf16 %v1776_v50, %v1775_v49 }
 0xba0   : > { %3881 = vmatpush3.bf16.msra.mxu1 %v3880_v52 }
 0xba1   : > { %3882 = vmatprep.subr.bf16.mxu1 %v4104_v44 }
 0xba4   : > { %3884 = vmatpush3.bf16.msra.mxu1 %v3883_v55 }
 0xba5   : > { %3885 = vmatprep.subr.bf16.mxu1 %v4104_v44 }
 0xba8   : > { %3887 = vmatpush3.bf16.msra.mxu1 %v3886_v58  ;;  %v3270_v58 = vld [vmem:[%s5027_s1 + $0x430] ss:$0 sm:$0xff] }
 0xba9   : > { %3888 = vmatprep.subr.bf16.mxu1 %v4104_v44 }
 0xbac   : > { %3890 = vmatpush3.bf16.msra.mxu1 %v3889_v62  ;;  %v3271_v62 = vld [vmem:[%s5027_s1 + $0x458] ss:$0 sm:$0xff] }
 0xbad   : > { %3891 = vmatprep.subr.bf16.mxu1 %v4104_v44 }
 0xbb0   : > { %3893 = vmatpush3.bf16.msra.mxu1 %v3892_v1 }
 0xbb1   : > { %3670 = vmatprep.subr.mxu1 %v4106_v48 }
 0xc66   : > { %v1556_v12 = vpop.f32.mrb[18].mxu1 }
 0xc67   : > { %v1560_v13 = vadd.f32 %v1556_v12, %v1320_v5  ;;  %v3587_v14 = vpop.f32.mrb[19].mxu1 }
 0xc69   : > { %v1561_v16 = vadd.f32 %v1560_v13, %v4491_v34  ;;  %v476_v34 = vld [vmem:[%s5027_s1 + $0x380] sm:$0xff] }
 0xc6a   : > { %v3865_v25 = vpack.c.bf16 %v476_v34, %v475_v24 }
 0xc6b   : > { %v4634_v17 = vadd.f32 %v3261_v15, %v1561_v16 }
 0xc6c   : > { %3866 = vmatpush3.bf16.msra.mxu0 %v3865_v25 }
 0xc6d   : > { %v1567_v18 = vsel %vm497_vm0, %v4634_v17, 0.0  ;;  %3867 = vmatprep.subr.bf16.mxu0 %v4104_v44 }
 0xc6e   : > { %1568 = vadd.xlane.f32.xlu1 %v1567_v18 }
 0xc70   : > { %3869 = vmatpush3.bf16.msra.mxu0 %v3868_v28 }
 0xc71   : > { %3894 = vmatprep.subr.bf16.mxu0 %v4104_v44 }
 0xcfb   : > { %v1569_v19 = vpop.xlane.xlu1 %1568 }
 0xcfc   : > { %v1570_v20 = vmul.f32 0.03125, %v1569_v19 }
 0xcfe   : > { %v1571_v21 = vsub.f32 %v4634_v17, %v1570_v20 }
 0xd00   : > { %v1572_v22 = vmul.f32 %v1571_v21, %v1571_v21 }
 0xd02   : > { %v1573_v23 = vsel %vm497_vm0, %v1572_v22, 0.0 }
 0xd03   : > { %1574 = vadd.xlane.f32.xlu1 %v1573_v23 }
 0xd90   : > { %v1575_v29 = vpop.xlane.xlu1 %1574 }
 0xd91   : > { %v1576_v30 = vmul.f32 0.03125, %v1575_v29 }
 0xd93   : > { %v1577_v31 = vadd.f32 1e-06, %v1576_v30 }
 0xd95   : > { %4008 = vrsqrt.f32 %v1577_v31 }
 0xd9f   : > { %v4009_v32 = vpop.eup %4008 }
 0xda0   : > { %v1579_v35 = vmul.f32 %v4009_v32, %v1571_v21 }
 0xda2   : > { %v1584_v37 = vmul.f32 %v3262_v33, %v1579_v35  ;;  %v3268_v33 = vld [vmem:[%s5027_s1 + $0x420] ss:$0 sm:$0xff] }
 0xda4   : > { %v1589_v38 = vadd.f32 %v3263_v36, %v1584_v37 }
 0xda6   : > { %3597 = vmatmul.mubr.msk.f32.vlgmr.msra.gmra.mrb[12].mxu0 %vm526_vm2, %v1589_v38 }
 0xda7   : > { %3642 = vmatprep.mubr.msk.f32.mxu0 %vm4105_vm1, %v4106_v48 }
 0xe79   : > { %v1663_v3 = vpop.f32.mrb[12].mxu0 }
 0xe7a   : > { %v1664_v4 = vadd.f32 %v3264_v2, %v1663_v3  ;;  %v3598_v60 = vpop.f32.mrb[13].mxu0 }
 0xe7c   : > { %v1668_v5 = vmul.f32 0.70710677, %v1664_v4  ;;  %v1667_v30 = vmul.f32 0.5, %v1664_v4 }
 0xe7e   : > { %v1669_v6 = vand.u32 2147483647, %v1668_v5  ;;  %v1685_v11 = vmul.f32 %v1668_v5, %v1668_v5  ;;  %vm1691_vm7 = vcmp.ge.f32.partialorder %v1668_v5, 0.0 }
 0xe80   : > { %v1670_v7 = vmul.f32 0.3275911, %v1669_v6  ;;  %v1686_v14 = vsub.f32 0.0, %v1685_v11 }
 0xe82   : > { %v1671_v8 = vadd.f32 1.0, %v1670_v7  ;;  %v1687_v18 = vmul.f32 1.442695, %v1686_v14 }
 0xe84   : > { %4010 = vrcp.f32 %v1671_v8 }
 0xe85   : > { %4012 = vpow2.f32 %v1687_v18 }
 0xe8e   : > { %v4011_v9 = vpop.eup %4010 }
 0xe8f   : > { %v1673_v10 = vmul.f32 %v4011_v9, %v1671_v8  ;;  %v4013_v25 = vpop.eup %4012 }
 0xe91   : > { %v1674_v12 = vsub.f32 2.0, %v1673_v10 }
 0xe93   : > { %v1675_v13 = vmul.f32 %v4011_v9, %v1674_v12 }
 0xe95   : > { %v1676_v15 = vmul.f32 1.0614054, %v1675_v13 }
 0xe97   : > { %v3266_v16 = vadd.f32 -1.4531521, %v1676_v15 }
 0xe99   : > { %v1678_v19 = vmul.f32 %v3266_v16, %v1675_v13  ;;  %v1778_v16 = vld [vmem:[%s5027_s1 + $0x460] sm:$0xff] }
 0xe9b   : > { %v1679_v20 = vadd.f32 1.4214138, %v1678_v19 }
 0xe9d   : > { %v1680_v21 = vmul.f32 %v1679_v20, %v1675_v13 }
 0xe9f   : > { %v3267_v22 = vadd.f32 -0.28449672, %v1680_v21 }
 0xea1   : > { %v1682_v23 = vmul.f32 %v3267_v22, %v1675_v13 }
 0xea3   : > { %v1683_v24 = vadd.f32 0.2548296, %v1682_v23 }
 0xea5   : > { %v1684_v34 = vmul.f32 %v1683_v24, %v1675_v13 }
 0xea7   : > { %v1689_v26 = vmul.f32 %v4013_v25, %v1684_v34 }
 0xea9   : > { %v1690_v27 = vsub.f32 1.0, %v1689_v26 }
 0xeab   : > { %v1692_v28 = vsub.f32 0.0, %v1690_v27 }
 0xead   : > { %v1693_v29 = vsel %vm1691_vm7, %v1690_v27, %v1692_v28 }
 0xeae   : > { %v1694_v31 = vadd.f32 1.0, %v1693_v29 }
 0xeb0   : > { %v1695_v32 = vmul.f32 %v1694_v31, %v1667_v30 }
 0xeb2   : > { %3632 = vmatmul.mubr.f32.vlgmr.msra.gmra.mrb[20].mxu1 %v1695_v32 }
 0xeb3   : > { %3672 = vmatprep.mubr.msk.f32.mxu1 %vm4105_vm1, %v4106_v48  ;;  %3671 = vmatpush3.msra.mxu1 %v1778_v16 }
 0xeb4   : > { %3680 = vmatprep.subr.mxu1 %v4106_v48 }
 0xf85   : > { %v1766_v35 = vpop.f32.mrb[20].mxu1 }
 0xf86   : > { %v1767_v36 = vadd.f32 %v3268_v33, %v1766_v35  ;;  %v3633_v37 = vpop.f32.mrb[21].mxu1  ;;  %v1779_v33 = vld [vmem:[%s5027_s1 + $0x468] sm:$0xff] }
 0xf88   : > { %v4728_v38 = vadd.f32 %v1767_v36, %v4634_v17  ;;  %v1774_v17 = vld [vmem:[%s5027_s1 + $0x440] sm:$0xff] }
 0xf89   : > { %v3895_v47 = vpack.c.bf16 %v1774_v17, %v1773_v46 }
 0xf8a   : > { %v1807_v39 = vsel %vm497_vm0, %v4728_v38, 0.0 }
 0xf8b   : > { %1808 = vadd.xlane.f32.xlu0 %v1807_v39  ;;  %3896 = vmatpush3.bf16.msra.mxu0 %v3895_v47 }
 0xf8c   : > { %3897 = vmatprep.subr.bf16.mxu0 %v4104_v44 }
 0xf8f   : > { %3899 = vmatpush3.bf16.msra.mxu0 %v3898_v51 }
 0xf90   : > { %3645 = vmatprep.subr.mxu0 %v4106_v48 }
0x1018   : > { %v1809_v40 = vpop.xlane.xlu0 %1808 }
0x1019   : > { %v1810_v41 = vmul.f32 0.03125, %v1809_v40 }
0x101b   : > { %v1811_v42 = vsub.f32 %v4728_v38, %v1810_v41 }
0x101d   : > { %v1812_v43 = vmul.f32 %v1811_v42, %v1811_v42 }
0x101f   : > { %v1813_v45 = vsel %vm497_vm0, %v1812_v43, 0.0 }
0x1020   : > { %1814 = vadd.xlane.f32.xlu1 %v1813_v45 }
0x10ad   : > { %v1815_v52 = vpop.xlane.xlu1 %1814 }
0x10ae   : > { %v1816_v53 = vmul.f32 0.03125, %v1815_v52 }
0x10b0   : > { %v1817_v54 = vadd.f32 1e-06, %v1816_v53 }
0x10b2   : > { %4014 = vrsqrt.f32 %v1817_v54 }
0x10bc   : > { %v4015_v55 = vpop.eup %4014 }
0x10bd   : > { %v1819_v57 = vmul.f32 %v4015_v55, %v1811_v42 }
0x10bf   : > { %v1824_v59 = vmul.f32 %v3269_v56, %v1819_v57 }
0x10c1   : > { %v1829_v61 = vadd.f32 %v3270_v58, %v1824_v59  ;;  %v1780_v58 = vld [vmem:[%s5027_s1 + $0x470] sm:$0xff] }
0x10c3   : > { %3643 = vmatmul.mubr.msk.f32.vlgmr.msra.gmra.mrb[14].mxu0 %vm526_vm2, %v1829_v61 }
0x10c4   : > { %3647 = vmatprep.mubr.msk.f32.mxu0 %vm4105_vm1, %v4106_v48 }
0x1196   : > { %v1903_v63 = vpop.f32.mrb[14].mxu0 }
0x1197   : > { %v4760_v0 = vadd.f32 %v3271_v62, %v1903_v63  ;;  %v3644_v1 = vpop.f32.mrb[15].mxu0 }
0x1199   : > { %1995 = vrot.lane.b32.xlu0 %v4760_v0, %s4107_s4  ;;  %1908 = vrot.lane.b32.xlu1 %v4760_v0, %s4108_s5 }
0x120b   : > { %v1909_v2 = vpop.permute.xlu1 %1908  ;;  %v1996_v3 = vpop.permute.xlu0 %1995 }
0x120c   : > { %3646 = vmatpush3.xpose.msk.msra.mxu0 %vm603_vm3, %v1909_v2 }
0x120d   : > { %3650 = vmatprep.subr.mxu0 %v4106_v48 }
0x120f   : > { %3648 = vmatmul.mubr.msk.f32.vlgmr.msra.gmra.mrb[16].mxu0 %vm603_vm3, %v4760_v0 }
0x1210   : > { %3651 = vmatpush3.msk.msra.mxu0 %vm696_vm4, %v1996_v3  ;;  %3652 = vmatprep.mubr.msk.f32.mxu0 %vm4105_vm1, %v4106_v48 }
0x1211   : > { %3655 = vmatprep.subr.mxu0 %v4106_v48 }
0x12e2   : > { %v1980_v4 = vpop.f32.mrb[16].mxu0 }
0x12e3   : > { %v3649_v60 = vpop.f32.mrb[17].mxu0  ;;  %v1984_v5 = vsel %vm678_vm5, %v1980_v4, -inf }
0x12e4   : > { %1985 = vmax.xlane.f32.xlu1 %v1984_v5 }
0x12f5   : > { %2072 = vrot.lane.b32.xlu1 %v4760_v0, %s4111_s24  ;;  %s3165_s24 = scalar_lea.sflag [#allocation3], %s134_s22 }
0x1371   : > { %v1986_v6 = vpop.xlane.xlu1 %1985 }
0x1372   : > { %v1987_v7 = vsub.f32 %v1980_v4, %v1986_v6 }
0x1374   : > { %v1988_v8 = vmul.f32 1.442695, %v1987_v7  ;;  %v1781_v7 = vld [vmem:[%s5027_s1 + $0x478] sm:$0xff] }
0x1375   : > { %v2073_v15 = vpop.permute.xlu1 %2072 }
0x1376   : > { %4016 = vpow2.f32 %v1988_v8 }
0x1380   : > { %v4017_v9 = vpop.eup %4016 }
0x1381   : > { %v1990_v10 = vsel %vm678_vm5, %v4017_v9, 0.0 }
0x1382   : > { %1991 = vadd.xlane.f32.xlu0 %v1990_v10 }
0x1398   : > { %2074 = vrot.lane.b32.xlu0 %v4760_v0, %s4109_s6  ;;  %s4984_s6 = scalar_lea.hbm %s5028_s2, %s3302_s28 }
0x140f   : > { %v1992_v11 = vpop.xlane.xlu0 %1991 }
0x1410   : > { %4018 = vrcp.f32 %v1992_v11 }
0x1413   : > { %v2075_v14 = vpop.permute.xlu0 %2074 }
0x141a   : > { %v4019_v12 = vpop.eup %4018 }
0x141b   : > { %v1994_v13 = vmul.f32 %v4019_v12, %v4017_v9 }
0x141d   : > { %3653 = vmatmul.mubr.msk.f32.vlgmr.msra.gmra.mrb[18].mxu0 %vm692_vm6, %v1994_v13 }
0x141e   : > { %3656 = vmatpush3.xpose.msk.msra.mxu0 %vm603_vm3, %v2075_v14  ;;  %3657 = vmatprep.mubr.msk.f32.mxu0 %vm4105_vm1, %v4106_v48 }
0x141f   : > { %3660 = vmatprep.subr.mxu0 %v4106_v48 }
0x1421   : > { %3658 = vmatmul.mubr.msk.f32.vlgmr.msra.gmra.mrb[20].mxu0 %vm603_vm3, %v2073_v15 }
0x1422   : > { %3662 = vmatprep.mubr.msk.f32.mxu0 %vm4105_vm1, %v4106_v48 }
0x14f0   : > { %v2068_v18 = vpop.f32.mrb[18].mxu0 }
0x14f1   : > { %v3654_v19 = vpop.f32.mrb[19].mxu0  ;;  %3673 = vmatmul.mubr.msk.f32.vlgmr.msra.gmra.mrb[22].mxu1 %vm603_vm3, %v2068_v18 }
0x14f2   : > { %3682 = vmatprep.mubr.msk.f32.mxu1 %vm4105_vm1, %v4106_v48  ;;  %v3293_v19 = vld [vmem:[%s5027_s1 + $0x480] ss:$0 sm:$0xff] }
0x14f4   : > { %v2146_v20 = vpop.f32.mrb[20].mxu0 }
0x14f5   : > { %v3659_v21 = vpop.f32.mrb[21].mxu0  ;;  %v2150_v22 = vsel %vm678_vm5, %v2146_v20, -inf }
0x14f6   : > { %2151 = vmax.xlane.f32.xlu0 %v2150_v22 }
0x150c   : > { %2161 = vrot.lane.b32.xlu0 %v4760_v0, %s4113_s7 }
0x1510   : > { %2384 = vrot.lane.b32.xlu0 %v4760_v0, %s4112_s26  ;;  %s4044_s26 = sshll.u32 %s4118_s13, 4  ;;  %s4045_s26 = int_to_ptr.vmem [resolvable:$false] %s4044_s26 }
0x1511   : > { %s4046_s7 = scalar_lea.vmem %s4045_s26, 32  ;;  %p4047_p0 = scmp.lt.s32.totalorder %s4986_s3, %s4045_s26 }
0x1583   : > { %v2152_v23 = vpop.xlane.xlu0 %2151 }
0x1584   : > { %v2153_v24 = vsub.f32 %v2146_v20, %v2152_v23 }
0x1586   : > { %v2154_v34 = vmul.f32 1.442695, %v2153_v24 }
0x1587   : > { %v2162_v25 = vpop.permute.xlu0 %2161 }
0x1588   : > { %4020 = vpow2.f32 %v2154_v34  ;;  %3661 = vmatpush3.msk.msra.mxu0 %vm696_vm4, %v2162_v25 }
0x1589   : > { %3665 = vmatprep.subr.mxu0 %v4106_v48 }
0x158b   : > { %v2385_v39 = vpop.permute.xlu0 %2384 }
0x1592   : > { %v4021_v26 = vpop.eup %4020 }
0x1593   : > { %v2156_v27 = vsel %vm678_vm5, %v4021_v26, 0.0 }
0x1594   : > { %2157 = vadd.xlane.f32.xlu1 %v2156_v27  ;;  %v1785_v27 = vld [vmem:[%s5027_s1 + $0x498] sm:$0xff] }
0x15a5   : > { %2386 = vrot.lane.b32.xlu1 %v4760_v0, %s4110_s25  ;;  %s4040_s25 = scalar_lea.vmem %s4986_s3, 16 }
0x15a6   : > { %p4041_p11 = scmp.ne.s32.totalorder %s4986_s3, %s4040_s25  ;;  %p4048_p1 = scmp.lt.s32.totalorder %s4046_s7, %s4040_s25 }
0x15a8   : > { %p4042_p12 = pnand %p4041_p11, %p4172_p5  ;;  %p4049_p2 = por %p4048_p1, %p4047_p0 }
0x15aa   : > { %p4043_p13 = pneg %p4042_p12 }
0x15ac   : > { %p4050_p3 = pnand %p4049_p2, %p4043_p13 }
0x15c4   : > { %v2380_v28 = vpop.f32.mrb[22].mxu1 }
0x15c5   : > { %v3674_v29 = vpop.f32.mrb[23].mxu1 }
0x15c6   : > { %v1787_v29 = vld [vmem:[%s5027_s1 + $0x4a8] sm:$0xff] }
0x1621   : > { %v2158_v30 = vpop.xlane.xlu1 %2157 }
0x1622   : > { %4022 = vrcp.f32 %v2158_v30  ;;  %v1788_v30 = vld [vmem:[%s5027_s1 + $0x4b0] sm:$0xff] }
0x1625   : > { %v2387_v36 = vpop.permute.xlu1 %2386 }
0x162c   : > { %v4023_v31 = vpop.eup %4022 }
0x162d   : > { %v2160_v32 = vmul.f32 %v4023_v31, %v4021_v26  ;;  %v3904_v31 = vpack.c.bf16 %v1788_v30, %v1787_v29 }
0x162f   : > { %3663 = vmatmul.mubr.msk.f32.vlgmr.msra.gmra.mrb[22].mxu0 %vm692_vm6, %v2160_v32 }
0x1630   : > { %3666 = vmatpush3.msra.mxu0 %v1779_v33  ;;  %3667 = vmatprep.mubr.msk.f32.mxu0 %vm4105_vm1, %v4106_v48 }
0x1631   : > { %3675 = vmatprep.subr.mxu0 %v4106_v48 }
0x1702   : > { %v2234_v35 = vpop.f32.mrb[22].mxu0 }
0x1703   : > { %v3664_v37 = vpop.f32.mrb[23].mxu0  ;;  %3668 = vmatmul.mubr.msk.f32.vlgmr.msra.gmra.mrb[24].mxu0 %vm603_vm3, %v2234_v35 }
0x1704   : > { %3676 = vmatpush3.xpose.msk.msra.mxu0 %vm603_vm3, %v2387_v36  ;;  %3677 = vmatprep.mubr.msk.f32.mxu0 %vm4105_vm1, %v4106_v48  ;;  %v3294_v37 = vld [vmem:[%s5027_s1 + $0x488] ss:$0 sm:$0xff] }
0x1705   : > { %3685 = vmatprep.subr.mxu0 %v4106_v48 }
0x1707   : > { %3678 = vmatmul.mubr.msk.f32.vlgmr.msra.gmra.mrb[26].mxu0 %vm603_vm3, %v2385_v39 }
0x1708   : > { %3687 = vmatprep.mubr.msk.f32.mxu0 %vm4105_vm1, %v4106_v48  ;;  %3686 = vmatpush3.msra.mxu0 %v1780_v58  ;;  %v1800_v58 = vld [vmem:[%s5027_s1 + $0x510] sm:$0xff] }
0x1709   : > { %3695 = vmatprep.subr.mxu0 %v4106_v48 }
0x17d6   : > { %v2307_v40 = vpop.f32.mrb[24].mxu0 }
0x17d7   : > { %v2381_v41 = vadd.f32 %v2380_v28, %v2307_v40  ;;  %v3669_v42 = vpop.f32.mrb[25].mxu0  ;;  %v3295_v40 = vld [vmem:[%s5027_s1 + $0x490] ss:$0 sm:$0xff] }
0x17da   : > { %v2458_v43 = vpop.f32.mrb[26].mxu0 }
0x17db   : > { %v3679_v45 = vpop.f32.mrb[27].mxu0  ;;  %v2462_v46 = vsel %vm678_vm5, %v2458_v43, -inf }
0x17dc   : > { %2463 = vmax.xlane.f32.xlu0 %v2462_v46  ;;  %v1791_v45 = vld [vmem:[%s5027_s1 + $0x4c8] sm:$0xff] }
0x17f2   : > { %2473 = vrot.lane.b32.xlu0 %v4760_v0, %s4114_s8 }
0x17f6   : > { %2624 = vrot.lane.b32.xlu0 %v4760_v0, %s4115_s14 }
0x1869   : > { %v2464_v17 = vpop.xlane.xlu0 %2463 }
0x186a   : > { %v2465_v47 = vsub.f32 %v2458_v43, %v2464_v17  ;;  %v1790_v43 = vld [vmem:[%s5027_s1 + $0x4c0] sm:$0xff]  ;;  %v1792_v17 = vld [vmem:[%s5027_s1 + $0x4d0] sm:$0xff] }
0x186b   : > { %v3907_v46 = vpack.c.bf16 %v1791_v45, %v1790_v43 }
0x186c   : > { %v2466_v49 = vmul.f32 1.442695, %v2465_v47 }
0x186d   : > { %v2474_v50 = vpop.permute.xlu0 %2473 }
0x186e   : > { %4024 = vpow2.f32 %v2466_v49  ;;  %3681 = vmatpush3.msk.msra.mxu1 %vm696_vm4, %v2474_v50  ;;  %v1794_v49 = vld [vmem:[%s5027_s1 + $0x4e0] sm:$0xff]  ;;  %v1795_v50 = vld [vmem:[%s5027_s1 + $0x4e8] sm:$0xff] }
0x186f   : > { %3690 = vmatprep.subr.mxu1 %v4106_v48 }
0x1871   : > { %v2625_v57 = vpop.permute.xlu0 %2624 }
0x1878   : > { %v4025_v51 = vpop.eup %4024 }
0x1879   : > { %v2468_v52 = vsel %vm678_vm5, %v4025_v51, 0.0 }
0x187a   : > { %2469 = vadd.xlane.f32.xlu1 %v2468_v52  ;;  %v1796_v52 = vld [vmem:[%s5027_s1 + $0x4f0] sm:$0xff] }
0x188b   : > { %2626 = vrot.lane.b32.xlu1 %v4760_v0, %s4116_s16 }
0x1907   : > { %v2470_v53 = vpop.xlane.xlu1 %2469 }
0x1908   : > { %4026 = vrcp.f32 %v2470_v53  ;;  %v1797_v53 = vld [vmem:[%s5027_s1 + $0x4f8] sm:$0xff] }
0x190b   : > { %v2627_v56 = vpop.permute.xlu1 %2626 }
0x1912   : > { %v4027_v54 = vpop.eup %4026 }
0x1913   : > { %v2472_v55 = vmul.f32 %v4027_v54, %v4025_v51  ;;  %v3913_v51 = vpack.c.bf16 %v1795_v50, %v1794_v49  ;;  %v3916_v54 = vpack.c.bf16 %v1797_v53, %v1796_v52  ;;  %v241_v49 = vld [vmem:[%s5027_s1 + $0x560] sm:$0xff] }
0x1915   : > { %3683 = vmatmul.mubr.msk.f32.vlgmr.msra.gmra.mrb[24].mxu1 %vm692_vm6, %v2472_v55  ;;  %v1798_v55 = vld [vmem:[%s5027_s1 + $0x500] sm:$0xff] }
0x1916   : > { %3691 = vmatpush3.xpose.msk.msra.mxu1 %vm603_vm3, %v2627_v56  ;;  %3692 = vmatprep.mubr.msk.f32.mxu1 %vm4105_vm1, %v4106_v48  ;;  %v1799_v56 = vld [vmem:[%s5027_s1 + $0x508] sm:$0xff] }
0x1917   : > { %3700 = vmatprep.subr.mxu1 %v4106_v48 }
0x1919   : > { %3693 = vmatmul.mubr.msk.f32.vlgmr.msra.gmra.mrb[26].mxu1 %vm603_vm3, %v2625_v57  ;;  %v3919_v57 = vpack.c.bf16 %v1799_v56, %v1798_v55 }
0x191a   : > { %3702 = vmatprep.mubr.msk.f32.mxu1 %vm4105_vm1, %v4106_v48  ;;  %3701 = vmatpush3.msra.mxu1 %v1781_v7 }
0x191b   : > { %3906 = vmatprep.subr.bf16.mxu1 %v4104_v44 }
0x19e8   : > { %v2546_v59 = vpop.f32.mrb[24].mxu1 }
0x19e9   : > { %v3684_v61 = vpop.f32.mrb[25].mxu1  ;;  %3688 = vmatmul.mubr.msk.f32.vlgmr.msra.gmra.mrb[28].mxu0 %vm603_vm3, %v2546_v59  ;;  %v1801_v59 = vld [vmem:[%s5027_s1 + $0x518] sm:$0xff] }
0x19ea   : > { %3697 = vmatprep.mubr.msk.f32.mxu0 %vm4105_vm1, %v4106_v48  ;;  %v3922_v61 = vpack.c.bf16 %v1801_v59, %v1800_v58  ;;  %v239_v58 = vld [vmem:[%s5027_s1 + $0x550] sm:$0x1] }
0x19ec   : > { %v2698_v62 = vpop.f32.mrb[26].mxu1 }
0x19ed   : > { %v3694_v63 = vpop.f32.mrb[27].mxu1  ;;  %v2702_v1 = vsel %vm678_vm5, %v2698_v62, -inf }
0x19ee   : > { %2703 = vmax.xlane.f32.xlu0 %v2702_v1  ;;  %v1803_v63 = vld [vmem:[%s5027_s1 + $0x528] sm:$0xff] }
0x1a04   : > { %2713 = vrot.lane.b32.xlu0 %v4760_v0, %s4117_s29 }
0x1a7b   : > { %v2704_v2 = vpop.xlane.xlu0 %2703 }
0x1a7c   : > { %v2705_v3 = vsub.f32 %v2698_v62, %v2704_v2  ;;  %v1802_v62 = vld [vmem:[%s5027_s1 + $0x520] sm:$0xff]  ;;  %v1804_v2 = vld [vmem:[%s5027_s1 + $0x530] sm:$0xff] }
0x1a7d   : > { %v3925_v1 = vpack.c.bf16 %v1803_v63, %v1802_v62  ;;  %v244_v62 = vld [vmem:[%s5027_s1 + $0x578] sm:$0x1] }
0x1a7e   : > { %v2706_v4 = vmul.f32 1.442695, %v2705_v3  ;;  %v1805_v3 = vld [vmem:[%s5027_s1 + $0x538] sm:$0xff] }
0x1a7f   : > { %v2714_v60 = vpop.permute.xlu0 %2713 }
0x1a80   : > { %4028 = vpow2.f32 %v2706_v4  ;;  %3696 = vmatpush3.msk.msra.mxu0 %vm696_vm4, %v2714_v60  ;;  %v3928_v4 = vpack.c.bf16 %v1805_v3, %v1804_v2  ;;  %v3296_v60 = vld [vmem:[%s5027_s1 + $0x4b8] ss:$0 sm:$0xff] }
0x1a81   : > { %3900 = vmatprep.subr.bf16.mxu0 %v4104_v44 }
0x1a8a   : > { %v4029_v5 = vpop.eup %4028 }
0x1a8b   : > { %v2708_v6 = vsel %vm678_vm5, %v4029_v5, 0.0 }
0x1a8c   : > { %2709 = vadd.xlane.f32.xlu1 %v2708_v6 }
0x1abc   : > { %v2619_v0 = vpop.f32.mrb[28].mxu0 }
0x1abd   : > { %v2623_v8 = vadd.f32 %v2619_v0, %v2381_v41  ;;  %v3689_v9 = vpop.f32.mrb[29].mxu0 }
0x1b19   : > { %v2710_v10 = vpop.xlane.xlu1 %2709 }
0x1b1a   : > { %4030 = vrcp.f32 %v2710_v10 }
0x1b24   : > { %v4031_v11 = vpop.eup %4030 }
0x1b25   : > { %v2712_v12 = vmul.f32 %v4031_v11, %v4029_v5 }
0x1b27   : > { %3698 = vmatmul.mubr.msk.f32.vlgmr.msra.gmra.mrb[30].mxu0 %vm692_vm6, %v2712_v12 }
0x1b28   : > { %3713 = vmatprep.mubr.msk.f32.mxu0 %vm4105_vm1, %v4106_v48 }
0x1bfa   : > { %v2786_v13 = vpop.f32.mrb[30].mxu0 }
0x1bfb   : > { %v3699_v14 = vpop.f32.mrb[31].mxu0  ;;  %3703 = vmatmul.mubr.msk.f32.vlgmr.msra.gmra.mrb[28].mxu1 %vm603_vm3, %v2786_v13 }
0x1bfc   : > { %3748 = vmatprep.mubr.msk.f32.mxu1 %vm4105_vm1, %v4106_v48  ;;  %3908 = vmatpush3.bf16.msra.mxu1 %v3907_v46 }
0x1bfd   : > { %3909 = vmatprep.subr.bf16.mxu1 %v4104_v44 }
0x1cce   : > { %v2859_v15 = vpop.f32.mrb[28].mxu1 }
0x1ccf   : > { %v2863_v16 = vadd.f32 %v2859_v15, %v2623_v8  ;;  %v3704_v18 = vpop.f32.mrb[29].mxu1 }
0x1cd1   : > { %v2864_v20 = vadd.f32 %v2863_v16, %v4728_v38  ;;  %v1786_v38 = vld [vmem:[%s5027_s1 + $0x4a0] sm:$0xff] }
0x1cd2   : > { %v3901_v28 = vpack.c.bf16 %v1786_v38, %v1785_v27 }
0x1cd3   : > { %v4865_v21 = vadd.f32 %v3293_v19, %v2864_v20 }
0x1cd4   : > { %3902 = vmatpush3.bf16.msra.mxu0 %v3901_v28 }
0x1cd5   : > { %v2870_v22 = vsel %vm497_vm0, %v4865_v21, 0.0  ;;  %3903 = vmatprep.subr.bf16.mxu0 %v4104_v44 }
0x1cd6   : > { %2871 = vadd.xlane.f32.xlu1 %v2870_v22 }
0x1cd8   : > { %3905 = vmatpush3.bf16.msra.mxu0 %v3904_v31 }
0x1cd9   : > { %3930 = vmatprep.subr.bf16.mxu0 %v4104_v44 }
0x1d63   : > { %v2872_v23 = vpop.xlane.xlu1 %2871 }
0x1d64   : > { %v2873_v24 = vmul.f32 0.03125, %v2872_v23 }
0x1d66   : > { %v2874_v34 = vsub.f32 %v4865_v21, %v2873_v24 }
0x1d68   : > { %v2875_v25 = vmul.f32 %v2874_v34, %v2874_v34 }
0x1d6a   : > { %v2876_v26 = vsel %vm497_vm0, %v2875_v25, 0.0 }
0x1d6b   : > { %2877 = vadd.xlane.f32.xlu1 %v2876_v26 }
0x1df8   : > { %v2878_v32 = vpop.xlane.xlu1 %2877 }
0x1df9   : > { %v2879_v33 = vmul.f32 0.03125, %v2878_v32 }
0x1dfb   : > { %v2880_v35 = vadd.f32 1e-06, %v2879_v33 }
0x1dfd   : > { %4032 = vrsqrt.f32 %v2880_v35 }
0x1e07   : > { %v4033_v36 = vpop.eup %4032 }
0x1e08   : > { %v2882_v39 = vmul.f32 %v4033_v36, %v2874_v34  ;;  %v3300_v36 = vld [vmem:[%s5027_s1 + $0x540] ss:$0 sm:$0xff] }
0x1e0a   : > { %v2887_v41 = vmul.f32 %v3294_v37, %v2882_v39 }
0x1e0c   : > { %v2892_v42 = vadd.f32 %v3295_v40, %v2887_v41 }
0x1e0e   : > { %3714 = vmatmul.mubr.msk.f32.vlgmr.msra.gmra.mrb[32].mxu0 %vm526_vm2, %v2892_v42 }
0x1e0f   : > { %3759 = vmatprep.mubr.msk.f32.mxu0 %vm4105_vm1, %v4106_v48  ;;  %v1793_v48 = vld [vmem:[%s5027_s1 + $0x4d8] sm:$0xff] }
0x1e10   : > { %v3910_v47 = vpack.c.bf16 %v1793_v48, %v1792_v17 }
0x1e12   : > { %3911 = vmatpush3.bf16.msra.mxu1 %v3910_v47  ;;  %v240_v47 = vld [vmem:[%s5027_s1 + $0x558] sm:$0xff] }
0x1e13   : > { %3912 = vmatprep.subr.bf16.mxu1 %v4104_v44  ;;  %v3931_v50 = vpack.c.bf16 %v241_v49, %v240_v47 }
0x1e15   : > { %3932 = vmatpush3.bf16.msra.mxu0 %v3931_v50 }
0x1e16   : > { %3914 = vmatpush3.bf16.msra.mxu1 %v3913_v51  ;;  %3933 = vmatprep.subr.bf16.mxu0 %v4104_v44  ;;  %v243_v51 = vld [vmem:[%s5027_s1 + $0x570] sm:$0xff] }
0x1e17   : > { %3915 = vmatprep.subr.bf16.mxu1 %v4104_v44 }
0x1e1a   : > { %3917 = vmatpush3.bf16.msra.mxu1 %v3916_v54 }
0x1e1b   : > { %3918 = vmatprep.subr.bf16.mxu1 %v4104_v44 }
0x1e1e   : > { %3920 = vmatpush3.bf16.msra.mxu1 %v3919_v57 }
0x1e1f   : > { %3921 = vmatprep.subr.bf16.mxu1 %v4104_v44 }
0x1e22   : > { %3923 = vmatpush3.bf16.msra.mxu1 %v3922_v61 }
0x1e23   : > { %3924 = vmatprep.subr.bf16.mxu1 %v4104_v44 }
0x1e26   : > { %3926 = vmatpush3.bf16.msra.mxu1 %v3925_v1 }
0x1e27   : > { %3927 = vmatprep.subr.bf16.mxu1 %v4104_v44  ;;  %v238_v44 = vld [vmem:[%s5027_s1 + $0x548] sm:$0x1] }
0x1e2a   : > { %3929 = vmatpush3.bf16.msra.mxu1 %v3928_v4 }
0x1ee1   : > { %v2966_v5 = vpop.f32.mrb[32].mxu0 }
0x1ee2   : > { %v2967_v6 = vadd.f32 %v3296_v60, %v2966_v5  ;;  %v3715_v7 = vpop.f32.mrb[33].mxu0 }
0x1ee4   : > { %v2971_v0 = vmul.f32 0.70710677, %v2967_v6  ;;  %v2970_v32 = vmul.f32 0.5, %v2967_v6 }
0x1ee6   : > { %v2972_v8 = vand.u32 2147483647, %v2971_v0  ;;  %v2988_v13 = vmul.f32 %v2971_v0, %v2971_v0  ;;  %vm2994_vm8 = vcmp.ge.f32.partialorder %v2971_v0, 0.0 }
0x1ee8   : > { %v2973_v9 = vmul.f32 0.3275911, %v2972_v8  ;;  %v2989_v16 = vsub.f32 0.0, %v2988_v13 }
0x1eea   : > { %v2974_v10 = vadd.f32 1.0, %v2973_v9  ;;  %v2990_v20 = vmul.f32 1.442695, %v2989_v16 }
0x1eec   : > { %4034 = vrcp.f32 %v2974_v10 }
0x1eed   : > { %4036 = vpow2.f32 %v2990_v20 }
0x1ef6   : > { %v4035_v11 = vpop.eup %4034 }
0x1ef7   : > { %v2976_v12 = vmul.f32 %v4035_v11, %v2974_v10  ;;  %v4037_v38 = vpop.eup %4036 }
0x1ef9   : > { %v2977_v14 = vsub.f32 2.0, %v2976_v12 }
0x1efb   : > { %v2978_v15 = vmul.f32 %v4035_v11, %v2977_v14 }
0x1efd   : > { %v2979_v18 = vmul.f32 1.0614054, %v2978_v15 }
0x1eff   : > { %v3298_v19 = vadd.f32 -1.4531521, %v2979_v18 }
0x1f01   : > { %v2981_v22 = vmul.f32 %v3298_v19, %v2978_v15 }
0x1f03   : > { %v2982_v23 = vadd.f32 1.4214138, %v2981_v22 }
0x1f05   : > { %v2983_v24 = vmul.f32 %v2982_v23, %v2978_v15 }
0x1f07   : > { %v3299_v34 = vadd.f32 -0.28449672, %v2983_v24 }
0x1f09   : > { %v2985_v25 = vmul.f32 %v3299_v34, %v2978_v15 }
0x1f0b   : > { %v2986_v26 = vadd.f32 0.2548296, %v2985_v25 }
0x1f0d   : > { %v2987_v27 = vmul.f32 %v2986_v26, %v2978_v15 }
0x1f0f   : > { %v2992_v28 = vmul.f32 %v4037_v38, %v2987_v27 }
0x1f11   : > { %v2993_v29 = vsub.f32 1.0, %v2992_v28 }
0x1f13   : > { %v2995_v30 = vsub.f32 0.0, %v2993_v29 }
0x1f15   : > { %v2996_v31 = vsel %vm2994_vm8, %v2993_v29, %v2995_v30 }
0x1f16   : > { %v2997_v33 = vadd.f32 1.0, %v2996_v31 }
0x1f18   : > { %v2998_v35 = vmul.f32 %v2997_v33, %v2970_v32 }
0x1f1a   : > { %3749 = vmatmul.mubr.f32.vlgmr.msra.gmra.mrb[30].mxu1 %v2998_v35 }
0x1fed   : > { %v3069_v37 = vpop.f32.mrb[30].mxu1 }
0x1fee   : > { %v3070_v39 = vadd.f32 %v3300_v36, %v3069_v37  ;;  %v3750_v40 = vpop.f32.mrb[31].mxu1 }
0x1ff0   : > { %v3073_v41 = vadd.f32 %v3070_v39, %v4865_v21  ;;  %v242_v21 = vld [vmem:[%s5027_s1 + $0x568] sm:$0xff] }
0x1ff1   : > { %v3934_v52 = vpack.c.bf16 %v243_v51, %v242_v21 }
0x1ff2   : > { %v3075_v42 = vsel %vm3074_vm9, %v3073_v41, 0.0 }
0x1ff3   : > { %3076 = vadd.xlane.f32.xlu1 %v3075_v42  ;;  %3935 = vmatpush3.bf16.msra.mxu0 %v3934_v52 }
0x2080   : > { %v3077_v43 = vpop.xlane.xlu1 %3076 }
0x2081   : > { %v3078_v45 = vmul.f32 0.03125, %v3077_v43 }
0x2083   : > { %v3079_v46 = vsub.f32 %v3073_v41, %v3078_v45 }
0x2085   : > { %v3080_v17 = vmul.f32 %v3079_v46, %v3079_v46 }
0x2087   : > { %v3081_v48 = vsel %vm3074_vm9, %v3080_v17, 0.0 }
0x2088   : > { %3082 = vadd.xlane.f32.xlu0 %v3081_v48 }
0x2115   : > { %v3083_v53 = vpop.xlane.xlu0 %3082 }
0x2116   : > { %v3084_v54 = vmul.f32 0.03125, %v3083_v53 }
0x2118   : > { %v3085_v55 = vadd.f32 1e-06, %v3084_v54 }
0x211a   : > { %4038 = vrsqrt.f32 %v3085_v55 }
0x2124   : > { %v4039_v56 = vpop.eup %4038 }
0x2125   : > { %v3087_v57 = vmul.f32 %v4039_v56, %v3079_v46 }
0x2127   : > { %v3088_v59 = vmul.f32 %v3087_v57, %v238_v44 }
0x2129   : > { %v3089_v61 = vadd.f32 %v3088_v59, %v239_v58 }
0x212b   : > { %3760 = vmatmul.mubr.msk.f32.vlgmr.msra.gmra.mrb[34].mxu0 %vm526_vm2, %v3089_v61 }
0x21fe   : > { %v3159_v63 = vpop.f32.mrb[34].mxu0 }
0x21ff   : > { %v3160_v1 = vadd.f32 %v3159_v63, %v244_v62  ;;  %v3761_v2 = vpop.f32.mrb[35].mxu0 }
0x2201   : > { %3163 = vst [vmem:[%s135_s30] sm:$0x1] %v3160_v1 }
0x2202   : > { %4053 = shalt.err (!%p4050_p3)
}
0x2203   : > { %s4054_s8 = scalar_lea.hbm %s4984_s6, 16  ;;  %s4058_s29 = scalar_lea.hbm %s5028_s2, 32 }
0x2204   : > { %p4055_p4 = scmp.ne.s32.totalorder %s4984_s6, %s4054_s8  ;;  %p4059_p9 = scmp.lt.u32.totalorder %s4984_s6, %s5028_s2 }
0x2205   : > { %p4060_p10 = scmp.lt.u32.totalorder %s4058_s29, %s4054_s8  ;;  %p4062_p12 = scmp.lt.u32.totalorder %s4054_s8, %s4984_s6 }
0x2206   : > { %p4056_p7 = pnand %p4055_p4, %p4172_p5 }
0x2207   : > { %p4061_p11 = por %p4060_p10, %p4059_p9 }
0x2208   : > { %p4057_p8 = pneg %p4056_p7 }
0x2209   : > { %p4063_p13 = por %p4062_p12, %p4061_p11 }
0x220b   : > { %p4064_p0 = pnand %p4063_p13, %p4057_p8 }
0x220d   : > { %4067 = shalt.err (!%p4064_p0)
}
0x220e   : > { %3937 = dma.vmem_to_hbm [thread:$0]  (%p4172_p5), %s4986_s3, 16, %s4984_s6, %s3165_s24  }
0x220f PF: > { %p3943_p1 = scmp.ge.s32.totalorder %s4102_s12, 2  ;;  %s3189_s22 = sand.u32 1, %s4090_s9  }
0x2210   : > { %s3190_s23 = scalar_lea.sflag [#allocation3], %s3189_s22 }
0x2211   : > { %p3940_p2 = pnand %p3943_p1, %p4176_p6 }
0x2213   : > { %4085 = dma.done.wait (!%p3940_p2), %s3190_s23, 16  }
0x2214   : > { %4087 = vsyncadd (!%p3940_p2), %s3190_s23, 4294967280  ;;  %p12_p3 = scmp.ge.s32.totalorder %s4159_s15, 4   ;;  %s5031_s9 = smov %s4094_s10 }
0x2215   : > { %s5032_s10 = smov %s4098_s11  ;;  %s5033_s11 = smov %s4170_s18 }
0x2216   : > { %s5034_s12 = smov %s4159_s15  ;;  %14 = sbr.rel (!%p12_p3) target bundleno = 3 (0x3), region = 63 }
0x221d   :  { %3194 = vsyncpa [#allocation3], 1 }
0x221e   :  { %3196 = vsyncpa [#allocation3 + $0x1], 1 }

</bundles_post_ra>
